<compile_context>
chip_gen: v6e
topology: v6e:2x2x1
jax: 0.10.0
libtpu: 0.0.40
codegen_flags: <defaults>
</compile_context>

<pallas_src>
import functools

import jax
import jax.numpy as jnp
from jax.experimental import pallas as pl
from jax.experimental.pallas import tpu as pltpu

HIDDEN = 256


def _round_up(v, m):
    return ((v + m - 1) // m) * m


def _mlp_kernel(x_ref, w1_ref, b1_ref, w2_ref, b2_ref, w3_ref, b3_ref,
                w4_ref, b4_ref, o_ref):
    """Pixels-in-lanes 4-layer MLP on one (C_in, TM) tile.

    x_ref : (1, C_in, TM)  pixels of one batch element (lane-dense)
    w1    : (256, C_in) f32      b1: (256, 1) f32
    w2,w3 : (256, 256)  bf16     b2,b3: (256, 1) f32
    w4    : (1, 256)    f32      b4: (1, 1) f32
    o_ref : (1, 1, TM)  lane-dense output tile
    """
    x = x_ref[0]                                            # (C_in, TM) f32

    # Layer 1: tiny K (=C_in), keep f32. (256, C_in) @ (C_in, TM) -> (256, TM)
    h = jnp.dot(w1_ref[...], x, preferred_element_type=jnp.float32)
    h = jnp.maximum(h + b1_ref[...], 0.0).astype(jnp.bfloat16)

    # Layer 2: bf16 MXU matmul (dominant FLOPs), f32 accumulation.
    h = jnp.dot(w2_ref[...], h, preferred_element_type=jnp.float32)
    h = jnp.maximum(h + b2_ref[...], 0.0).astype(jnp.bfloat16)

    # Layer 3: bf16 MXU matmul, f32 accumulation.
    h = jnp.dot(w3_ref[...], h, preferred_element_type=jnp.float32)
    h = jnp.maximum(h + b3_ref[...], 0.0)

    # Layer 4: (1, 256) @ (256, TM) -> (1, TM)  (fills all output lanes).
    out = jnp.dot(w4_ref[...], h, preferred_element_type=jnp.float32)
    o_ref[...] = (out + b4_ref[...]).reshape(o_ref.shape).astype(o_ref.dtype)


@functools.partial(jax.jit, static_argnames=("tm",))
def simple_sampling_net(x, params, *, tm=1024):
    """x: (N, C_in, H, W) float32 (NCHW, same as the PyTorch module)."""
    w1, b1, w2, b2, w3, b3, w4, b4 = params
    n, c_in, h, w = x.shape
    hw = h * w

    # One-time bf16 casts for the MXU-heavy layers (outside the kernel hot loop).
    w2_b = w2.astype(jnp.bfloat16)
    w3_b = w3.astype(jnp.bfloat16)

    # NCHW -> (N, C_in, H*W): pure reshape, pixels land in the lane dim.
    x_rows = x.reshape(n, c_in, hw)

    # Pixel-tile size: multiple of 128 lanes, no bigger than the padded row.
    tm_eff = min(tm, _round_up(hw, 128))
    hw_pad = _round_up(hw, tm_eff)
    if hw_pad != hw:
        x_rows = jnp.pad(x_rows, ((0, 0), (0, 0), (0, hw_pad - hw)))

    grid = (n, hw_pad // tm_eff)

    out = pl.pallas_call(
        _mlp_kernel,
        out_shape=jax.ShapeDtypeStruct((n, 1, hw_pad), jnp.float32),
        grid_spec=pltpu.PrefetchScalarGridSpec(
            num_scalar_prefetch=0,
            grid=grid,
            in_specs=[
                pl.BlockSpec((1, c_in, tm_eff), lambda b, i: (b, 0, i)),  # x
                pl.BlockSpec((HIDDEN, c_in), lambda b, i: (0, 0)),        # w1
                pl.BlockSpec((HIDDEN, 1), lambda b, i: (0, 0)),           # b1
                pl.BlockSpec((HIDDEN, HIDDEN), lambda b, i: (0, 0)),      # w2
                pl.BlockSpec((HIDDEN, 1), lambda b, i: (0, 0)),           # b2
                pl.BlockSpec((HIDDEN, HIDDEN), lambda b, i: (0, 0)),      # w3
                pl.BlockSpec((HIDDEN, 1), lambda b, i: (0, 0)),           # b3
                pl.BlockSpec((1, HIDDEN), lambda b, i: (0, 0)),           # w4
                pl.BlockSpec((1, 1), lambda b, i: (0, 0)),                # b4
            ],
            out_specs=pl.BlockSpec((1, 1, tm_eff), lambda b, i: (b, 0, i)),
        ),
        compiler_params=pltpu.CompilerParams(
            dimension_semantics=("parallel", "parallel"),
            vmem_limit_bytes=32 * 1024 * 1024),
    )(x_rows, w1, b1, w2_b, b2, w3_b, b3, w4, b4)

    # (N, 1, HW_pad) -> strip pad -> NCHW (N, 1, H, W). No transpose needed.
    return out[:, :, :hw].reshape(n, 1, h, w)


def init_params(key, n_feature):
    """Deterministic synthetic init in native Conv2d(k=1) (C_out, C_in) f32 layout."""
    ks = jax.random.split(key, 8)
    scale = 0.05

    def lin(kw, kb, fan_in, fan_out):
        w = scale * jax.random.normal(kw, (fan_out, fan_in), jnp.float32)
        b = scale * jax.random.normal(kb, (fan_out, 1), jnp.float32)
        return w, b

    w1, b1 = lin(ks[0], ks[1], n_feature, HIDDEN)
    w2, b2 = lin(ks[2], ks[3], HIDDEN, HIDDEN)
    w3, b3 = lin(ks[4], ks[5], HIDDEN, HIDDEN)
    w4, b4 = lin(ks[6], ks[7], HIDDEN, 1)
    return (w1, b1, w2, b2, w3, b3, w4, b4)


def _reference(x, params):
    """Pure-JAX reference of the same forward pass (same bf16 casts as kernel)."""
    w1, b1, w2, b2, w3, b3, w4, b4 = params
    n, c, hgt, wid = x.shape
    r = x.reshape(n, c, hgt * wid)

    def lin(wt, bias, v, cast=False):
        if cast:
            wt = wt.astype(jnp.bfloat16)
            v = v.astype(jnp.bfloat16)
        return jnp.einsum("oc,ncm->nom", wt, v,
                          preferred_element_type=jnp.float32) + bias[None]

    hdn = jnp.maximum(lin(w1, b1, r), 0.0)
    hdn = jnp.maximum(lin(w2, b2, hdn, cast=True), 0.0)
    hdn = jnp.maximum(lin(w3, b3, hdn, cast=True), 0.0)
    out = lin(w4, b4, hdn)
    return out.reshape(n, 1, hgt, wid)


if __name__ == "__main__":
    key = jax.random.PRNGKey(0)
    k_x, k_p = jax.random.split(key)

    N, C_IN, H, W = 2, 4, 16, 16
    x = jax.random.normal(k_x, (N, C_IN, H, W), jnp.float32)
    params = init_params(k_p, C_IN)

    out = simple_sampling_net(x, params)
    out = jax.block_until_ready(out)

    ref = _reference(x, params)
    assert out.shape == (N, 1, H, W), out.shape
    assert jnp.allclose(out, ref, atol=2e-3, rtol=2e-2), float(
        jnp.max(jnp.abs(out - ref)))

    print("KERNEL_OK")
</pallas_src>

<mosaic_0001>
module attributes {stable_mosaic.version = 11 : i64} {
  func.func @_mlp_kernel(%arg0: i32, %arg1: i32, %arg2: memref<1x4x256xf32, #tpu.memory_space<vmem>>, %arg3: memref<256x4xf32, #tpu.memory_space<vmem>>, %arg4: memref<256x1xf32, #tpu.memory_space<vmem>>, %arg5: memref<256x256xbf16, #tpu.memory_space<vmem>>, %arg6: memref<256x1xf32, #tpu.memory_space<vmem>>, %arg7: memref<256x256xbf16, #tpu.memory_space<vmem>>, %arg8: memref<256x1xf32, #tpu.memory_space<vmem>>, %arg9: memref<1x256xf32, #tpu.memory_space<vmem>>, %arg10: memref<1x1xf32, #tpu.memory_space<vmem>>, %arg11: memref<1x1x256xf32, #tpu.memory_space<vmem>>) attributes {dimension_semantics = [#tpu.dimension_semantics<parallel>, #tpu.dimension_semantics<parallel>], iteration_bounds = array<i64: 2, 1>, scalar_prefetch = 0 : i64, scratch_operands = 0 : i64, tpu.core_type = #tpu.core_type<tc>, window_params = [{transform_indices = @transform_0, window_bounds = array<i64: 1, 4, 256>}, {pipeline_mode = #tpu.pipeline_mode<synchronous>, transform_indices = @transform_1, window_bounds = array<i64: 256, 4>}, {pipeline_mode = #tpu.pipeline_mode<synchronous>, transform_indices = @transform_2, window_bounds = array<i64: 256, 1>}, {pipeline_mode = #tpu.pipeline_mode<synchronous>, transform_indices = @transform_3, window_bounds = array<i64: 256, 256>}, {pipeline_mode = #tpu.pipeline_mode<synchronous>, transform_indices = @transform_4, window_bounds = array<i64: 256, 1>}, {pipeline_mode = #tpu.pipeline_mode<synchronous>, transform_indices = @transform_5, window_bounds = array<i64: 256, 256>}, {pipeline_mode = #tpu.pipeline_mode<synchronous>, transform_indices = @transform_6, window_bounds = array<i64: 256, 1>}, {pipeline_mode = #tpu.pipeline_mode<synchronous>, transform_indices = @transform_7, window_bounds = array<i64: 1, 256>}, {pipeline_mode = #tpu.pipeline_mode<synchronous>, transform_indices = @transform_8, window_bounds = array<i64: 1, 1>}, {transform_indices = @transform_9, window_bounds = array<i64: 1, 1, 256>}]} {
    %c0 = arith.constant 0 : index
    %c0_0 = arith.constant 0 : index
    %c0_1 = arith.constant 0 : index
    %0 = vector.load %arg2[%c0, %c0_0, %c0_1] : memref<1x4x256xf32, #tpu.memory_space<vmem>>, vector<1x4x256xf32>
    %1 = vector.shape_cast %0 : vector<1x4x256xf32> to vector<4x256xf32>
    %c0_2 = arith.constant 0 : index
    %c0_3 = arith.constant 0 : index
    %2 = vector.load %arg3[%c0_2, %c0_3] : memref<256x4xf32, #tpu.memory_space<vmem>>, vector<256x4xf32>
    %cst = arith.constant dense<0.000000e+00> : vector<256x256xf32>
    %3 = tpu.matmul %2, %1, %cst {dimension_numbers = #tpu.dot_dimension_numbers<[1], [0], [0], [1], [0, 0, 1, 1], [], []>} : vector<256x4xf32>, vector<4x256xf32>, vector<256x256xf32> -> vector<256x256xf32>
    %c0_4 = arith.constant 0 : index
    %c0_5 = arith.constant 0 : index
    %4 = vector.load %arg4[%c0_4, %c0_5] : memref<256x1xf32, #tpu.memory_space<vmem>>, vector<256x1xf32>
    %5 = vector.broadcast %4 : vector<256x1xf32> to vector<256x256xf32>
    %6 = arith.addf %3, %5 : vector<256x256xf32>
    %cst_6 = arith.constant 0.000000e+00 : f32
    %7 = vector.broadcast %cst_6 : f32 to vector<256x256xf32>
    %8 = arith.maximumf %6, %7 : vector<256x256xf32>
    %9 = arith.truncf %8 : vector<256x256xf32> to vector<256x256xbf16>
    %c0_7 = arith.constant 0 : index
    %c0_8 = arith.constant 0 : index
    %10 = vector.load %arg5[%c0_7, %c0_8] : memref<256x256xbf16, #tpu.memory_space<vmem>>, vector<256x256xbf16>
    %cst_9 = arith.constant dense<0.000000e+00> : vector<256x256xf32>
    %11 = tpu.matmul %10, %9, %cst_9 {dimension_numbers = #tpu.dot_dimension_numbers<[1], [0], [0], [1], [0, 0, 1, 1], [], []>} : vector<256x256xbf16>, vector<256x256xbf16>, vector<256x256xf32> -> vector<256x256xf32>
    %c0_10 = arith.constant 0 : index
    %c0_11 = arith.constant 0 : index
    %12 = vector.load %arg6[%c0_10, %c0_11] : memref<256x1xf32, #tpu.memory_space<vmem>>, vector<256x1xf32>
    %13 = vector.broadcast %12 : vector<256x1xf32> to vector<256x256xf32>
    %14 = arith.addf %11, %13 : vector<256x256xf32>
    %cst_12 = arith.constant 0.000000e+00 : f32
    %15 = vector.broadcast %cst_12 : f32 to vector<256x256xf32>
    %16 = arith.maximumf %14, %15 : vector<256x256xf32>
    %17 = arith.truncf %16 : vector<256x256xf32> to vector<256x256xbf16>
    %c0_13 = arith.constant 0 : index
    %c0_14 = arith.constant 0 : index
    %18 = vector.load %arg7[%c0_13, %c0_14] : memref<256x256xbf16, #tpu.memory_space<vmem>>, vector<256x256xbf16>
    %cst_15 = arith.constant dense<0.000000e+00> : vector<256x256xf32>
    %19 = tpu.matmul %18, %17, %cst_15 {dimension_numbers = #tpu.dot_dimension_numbers<[1], [0], [0], [1], [0, 0, 1, 1], [], []>} : vector<256x256xbf16>, vector<256x256xbf16>, vector<256x256xf32> -> vector<256x256xf32>
    %c0_16 = arith.constant 0 : index
    %c0_17 = arith.constant 0 : index
    %20 = vector.load %arg8[%c0_16, %c0_17] : memref<256x1xf32, #tpu.memory_space<vmem>>, vector<256x1xf32>
    %21 = vector.broadcast %20 : vector<256x1xf32> to vector<256x256xf32>
    %22 = arith.addf %19, %21 : vector<256x256xf32>
    %cst_18 = arith.constant 0.000000e+00 : f32
    %23 = vector.broadcast %cst_18 : f32 to vector<256x256xf32>
    %24 = arith.maximumf %22, %23 : vector<256x256xf32>
    %c0_19 = arith.constant 0 : index
    %c0_20 = arith.constant 0 : index
    %25 = vector.load %arg9[%c0_19, %c0_20] : memref<1x256xf32, #tpu.memory_space<vmem>>, vector<1x256xf32>
    %cst_21 = arith.constant dense<0.000000e+00> : vector<1x256xf32>
    %26 = tpu.matmul %25, %24, %cst_21 {dimension_numbers = #tpu.dot_dimension_numbers<[1], [0], [0], [1], [0, 0, 1, 1], [], []>} : vector<1x256xf32>, vector<256x256xf32>, vector<1x256xf32> -> vector<1x256xf32>
    %c0_22 = arith.constant 0 : index
    %c0_23 = arith.constant 0 : index
    %27 = vector.load %arg10[%c0_22, %c0_23] : memref<1x1xf32, #tpu.memory_space<vmem>>, vector<1x1xf32>
    %28 = vector.broadcast %27 : vector<1x1xf32> to vector<1x256xf32>
    %29 = arith.addf %26, %28 : vector<1x256xf32>
    %30 = vector.shape_cast %29 : vector<1x256xf32> to vector<1x1x256xf32>
    %c0_24 = arith.constant 0 : index
    %c0_25 = arith.constant 0 : index
    %c0_26 = arith.constant 0 : index
    %31 = vector.load %arg11[%c0_24, %c0_25, %c0_26] : memref<1x1x256xf32, #tpu.memory_space<vmem>>, vector<1x1x256xf32>
    tpu.vector_store %arg11[%c0_24, %c0_25, %c0_26], %30 {strides = array<i32>} : memref<1x1x256xf32, #tpu.memory_space<vmem>>, vector<1x1x256xf32>,
    return
  }
  func.func @transform_0(%arg0: i32, %arg1: i32) -> (i32, i32, i32) {
    %c0_i32 = arith.constant 0 : i32
    %c0_i32_0 = arith.constant 0 : i32
    return %arg0, %c0_i32, %arg1 : i32, i32, i32
  }
  func.func @transform_1(%arg0: i32, %arg1: i32) -> (i32, i32) {
    %c0_i32 = arith.constant 0 : i32
    %c0_i32_0 = arith.constant 0 : i32
    %c0_i32_1 = arith.constant 0 : i32
    return %c0_i32, %c0_i32_0 : i32, i32
  }
  func.func @transform_2(%arg0: i32, %arg1: i32) -> (i32, i32) {
    %c0_i32 = arith.constant 0 : i32
    %c0_i32_0 = arith.constant 0 : i32
    %c0_i32_1 = arith.constant 0 : i32
    return %c0_i32, %c0_i32_0 : i32, i32
  }
  func.func @transform_3(%arg0: i32, %arg1: i32) -> (i32, i32) {
    %c0_i32 = arith.constant 0 : i32
    %c0_i32_0 = arith.constant 0 : i32
    %c0_i32_1 = arith.constant 0 : i32
    return %c0_i32, %c0_i32_0 : i32, i32
  }
  func.func @transform_4(%arg0: i32, %arg1: i32) -> (i32, i32) {
    %c0_i32 = arith.constant 0 : i32
    %c0_i32_0 = arith.constant 0 : i32
    %c0_i32_1 = arith.constant 0 : i32
    return %c0_i32, %c0_i32_0 : i32, i32
  }
  func.func @transform_5(%arg0: i32, %arg1: i32) -> (i32, i32) {
    %c0_i32 = arith.constant 0 : i32
    %c0_i32_0 = arith.constant 0 : i32
    %c0_i32_1 = arith.constant 0 : i32
    return %c0_i32, %c0_i32_0 : i32, i32
  }
  func.func @transform_6(%arg0: i32, %arg1: i32) -> (i32, i32) {
    %c0_i32 = arith.constant 0 : i32
    %c0_i32_0 = arith.constant 0 : i32
    %c0_i32_1 = arith.constant 0 : i32
    return %c0_i32, %c0_i32_0 : i32, i32
  }
  func.func @transform_7(%arg0: i32, %arg1: i32) -> (i32, i32) {
    %c0_i32 = arith.constant 0 : i32
    %c0_i32_0 = arith.constant 0 : i32
    %c0_i32_1 = arith.constant 0 : i32
    return %c0_i32, %c0_i32_0 : i32, i32
  }
  func.func @transform_8(%arg0: i32, %arg1: i32) -> (i32, i32) {
    %c0_i32 = arith.constant 0 : i32
    %c0_i32_0 = arith.constant 0 : i32
    %c0_i32_1 = arith.constant 0 : i32
    return %c0_i32, %c0_i32_0 : i32, i32
  }
  func.func @transform_9(%arg0: i32, %arg1: i32) -> (i32, i32, i32) {
    %c0_i32 = arith.constant 0 : i32
    %c0_i32_0 = arith.constant 0 : i32
    return %arg0, %c0_i32, %arg1 : i32, i32, i32
  }
}

</mosaic_0001>

<bundles_post_ra>
// kernel: simple_sampling_net.1
= control target key start
LH: loop header
LB: loop body
LE: loop exit
PB: predicated region body
PF: predicated region fallthrough
CT: control target
= control target key end

     0   :  { %s2882_s11 = smov 0   ;;  %s2884_s12 = smov 0   ;;  %s4071_s0 = inlined_call_operand.vmem [shape: f32[2,4,256], index: 0, kind: input, shape index: {}]   ;;  %s4072_s1 = inlined_call_operand.vmem [shape: f32[256,4], index: 1, kind: input, shape index: {}]   ;;  %s4073_s2 = inlined_call_operand.vmem [shape: f32[256,1], index: 2, kind: input, shape index: {}]   ;;  %s4074_s3 = inlined_call_operand.vmem [shape: bf16[256,256], index: 3, kind: input, shape index: {}]   ;;  %s4075_s4 = inlined_call_operand.vmem [shape: f32[256,1], index: 4, kind: input, shape index: {}]   ;;  %s4076_s5 = inlined_call_operand.vmem [shape: bf16[256,256], index: 5, kind: input, shape index: {}]   ;;  %s4077_s6 = inlined_call_operand.vmem [shape: f32[256,1], index: 6, kind: input, shape index: {}]   ;;  %s4078_s7 = inlined_call_operand.vmem [shape: f32[1,256], index: 7, kind: input, shape index: {}]   ;;  %s4079_s8 = inlined_call_operand.<no memory space> [shape: f32[1,1], index: 8, kind: input, shape index: {}]   ;;  %s4080_s9 = inlined_call_operand.vmem [shape: f32[2,1,256], index: 9, kind: output, shape index: {}]  }
   0x1   :  { %v14_v0 = vstv %s4079_s8  ;;  %s2886_s13 = smov 0  }
   0x2   :  { %15 = vst [vmem:[#allocation2] sm:$0x1] %v14_v0 }
   0x3 LB: > { %s33_s8 = sadd.s32 1, %s2820_s12  ;;  %p2569_p0 = scmp.ge.s32.totalorder %s2824_s13, 1  ;;  %s2824_s13 = sphi %s2886_s13, %s21_s13   ;;  %s2820_s12 = sphi %s2884_s12, %s4149_s12   ;;  %s2816_s11 = sphi %s2882_s11, %s4148_s11  }
   0x4   : > { %p35_p1 = scmp.ge.s32.totalorder %s33_s8, 2  ;;  %p310_p2 = scmp.lt.s32.totalorder %s2824_s13, 3 }
   0x6   : > { %s4151_s8 = smov (%p35_p1, %s33_s8), 0  ;;  %p311_p3 = pnand %p2569_p0, %p310_p2 }
   0x8   : > { %314 = sbr.rel (%p311_p3) target bundleno = 1265 (0x4f1), region = 56 }
   0xd   : > { %v419_v1 = vld [vmem:[%s4073_s2 + $0x70] sm:$0xff]  ;;  %v417_v2 = vld [vmem:[%s4073_s2 + $0x60] sm:$0xff]  ;;  %p354_p4 = scmp.lt.s32.totalorder %s2816_s11, 1  ;;  %v2826_v3 = vmov 0   ;;  %v420_v4 = vld [vmem:[%s4073_s2 + $0x78] sm:$0xff]  ;;  %v2827_v6 = vmov 0.0  }
   0xe   : > { %2704 = vset.pattern.permute.xlu1 %v2826_v3  ;;  %2703 = vset.pattern.permute.xlu0 %v2826_v3  ;;  %v418_v5 = vld [vmem:[%s4073_s2 + $0x68] sm:$0xff]  ;;  %vm696_vm0 = vcmask 1043456   ;;  %v416_v9 = vld [vmem:[%s4073_s2 + $0x58] sm:$0xff]  ;;  %v415_v10 = vld [vmem:[%s4073_s2 + $0x50] sm:$0xff]  ;;  %vm599_vm1 = vcmask 31744  }
   0xf   : > { %509 = vperm.xlu0 %2703, %v419_v1   ;;  %499 = vperm.xlu1 %2704, %v417_v2   ;;  %s4153_s11 = smov (!%p354_p4, %s2816_s11), 1  ;;  %v373_v11 = vld [vmem:[%s4072_s1] sm:$0xff]  ;;  %v414_v13 = vld [vmem:[%s4073_s2 + $0x48] sm:$0xff]  ;;  %v412_v17 = vld [vmem:[%s4073_s2 + $0x38] sm:$0xff] }
  0x10   : > { %765 = vmatprep.mubr.f32.mxu0 %v2827_v6  ;;  %861 = vmatprep.mubr.f32.mxu1 %v2827_v6  ;;  %s2673_s22 = sshll.u32 %s4153_s11, 3  ;;  %v389_v12 = vld [vmem:[%s4072_s1 + $0x80] sm:$0xff]  ;;  %v374_v15 = vld [vmem:[%s4072_s1 + $0x8] sm:$0xff]  ;;  %v411_v18 = vld [vmem:[%s4073_s2 + $0x30] sm:$0xff]  ;;  %s2572_s26 = sshll.u32 %s4153_s11, 1 }
  0x11   : > { %s361_s25 = scalar_lea.vmem %s4071_s0, %s2673_s22  ;;  %v413_v14 = vld [vmem:[%s4073_s2 + $0x40] sm:$0xff]  ;;  %v390_v16 = vld [vmem:[%s4072_s1 + $0x88] sm:$0xff]  ;;  %v375_v19 = vld [vmem:[%s4072_s1 + $0x10] sm:$0xff]  ;;  %s370_s29 = scalar_lea.vmem %s4080_s9, %s2572_s26 }
  0x12   : > { %v372_v7 = vld [vmem:[%s361_s25] sm:$0xff]  ;;  %v391_v20 = vld [vmem:[%s4072_s1 + $0x90] sm:$0xff]  ;;  %v410_v21 = vld [vmem:[%s4073_s2 + $0x28] sm:$0xff] }
  0x13   : > { %514 = vperm.xlu0 %2703, %v420_v4   ;;  %504 = vperm.xlu1 %2704, %v418_v5   ;;  %v598_v8 = vcombine.high %v372_v7, %v372_v7  ;;  %v409_v22 = vld [vmem:[%s4073_s2 + $0x20] sm:$0xff]  ;;  %v376_v23 = vld [vmem:[%s4072_s1 + $0x18] sm:$0xff]  ;;  %v407_v26 = vld [vmem:[%s4073_s2 + $0x10] sm:$0xff] }
  0x14   : > { %v392_v24 = vld [vmem:[%s4072_s1 + $0x98] sm:$0xff]  ;;  %v377_v27 = vld [vmem:[%s4072_s1 + $0x20] sm:$0xff]  ;;  %v406_v29 = vld [vmem:[%s4073_s2 + $0x8] sm:$0xff] }
  0x15   : > { %2573 = vmatprep.subr.msk.mxu0 %vm696_vm0, %v598_v8  ;;  %2674 = vmatprep.subr.msk.mxu1 %vm696_vm0, %v598_v8  ;;  %v408_v25 = vld [vmem:[%s4073_s2 + $0x18] sm:$0xff]  ;;  %v393_v28 = vld [vmem:[%s4072_s1 + $0xa0] sm:$0xff]  ;;  %v378_v31 = vld [vmem:[%s4072_s1 + $0x28] sm:$0xff] }
  0x16   : > { %2574 = vmatpush1.msk.msra.mxu0 %vm696_vm0, %v372_v7  ;;  %2675 = vmatpush1.msk.msra.mxu1 %vm696_vm0, %v372_v7  ;;  %v405_v30 = vld [vmem:[%s4073_s2] sm:$0xff]  ;;  %v394_v32 = vld [vmem:[%s4072_s1 + $0xa8] sm:$0xff]  ;;  %v436_v33 = vld [vmem:[%s4073_s2 + $0xf8] sm:$0xff] }
  0x17   : > { %494 = vperm.xlu1 %2704, %v416_v9   ;;  %489 = vperm.xlu0 %2703, %v415_v10   ;;  %v435_v34 = vld [vmem:[%s4073_s2 + $0xf0] sm:$0xff]  ;;  %v434_v37 = vld [vmem:[%s4073_s2 + $0xe8] sm:$0xff]  ;;  %v433_v38 = vld [vmem:[%s4073_s2 + $0xe0] sm:$0xff] }
  0x18   : > { %2575 = vmatmul.mubr.msk.f32.vlgmr.msra.gmra.mxu0 %vm599_vm1, %v373_v11  ;;  %2591 = vmatmul.mubr.msk.f32.vlgmr.msra.gmra.mxu1 %vm599_vm1, %v389_v12  ;;  %v379_v35 = vld [vmem:[%s4072_s1 + $0x30] sm:$0xff]  ;;  %v380_v39 = vld [vmem:[%s4072_s1 + $0x38] sm:$0xff]  ;;  %v381_v43 = vld [vmem:[%s4072_s1 + $0x40] sm:$0xff] }
  0x19   : > { %771 = vmatprep.mubr.f32.mxu0 %v2827_v6  ;;  %867 = vmatprep.mubr.f32.mxu1 %v2827_v6  ;;  %v395_v36 = vld [vmem:[%s4072_s1 + $0xb0] sm:$0xff]  ;;  %v396_v40 = vld [vmem:[%s4072_s1 + $0xb8] sm:$0xff]  ;;  %v397_v44 = vld [vmem:[%s4072_s1 + $0xc0] sm:$0xff] }
  0x1a   : > { %v432_v41 = vld [vmem:[%s4073_s2 + $0xd8] sm:$0xff]  ;;  %v431_v42 = vld [vmem:[%s4073_s2 + $0xd0] sm:$0xff]  ;;  %v430_v45 = vld [vmem:[%s4073_s2 + $0xc8] sm:$0xff] }
  0x1b   : > { %484 = vperm.xlu1 %2704, %v414_v13   ;;  %479 = vperm.xlu0 %2703, %v413_v14   ;;  %v429_v46 = vld [vmem:[%s4073_s2 + $0xc0] sm:$0xff]  ;;  %v382_v47 = vld [vmem:[%s4072_s1 + $0x48] sm:$0xff]  ;;  %v428_v49 = vld [vmem:[%s4073_s2 + $0xb8] sm:$0xff] }
  0x1c   : > { %2576 = vmatmul.mubr.msk.f32.gmra.mxu0 %vm599_vm1, %v374_v15  ;;  %2592 = vmatmul.mubr.msk.f32.gmra.mxu1 %vm599_vm1, %v390_v16  ;;  %v398_v48 = vld [vmem:[%s4072_s1 + $0xc8] sm:$0xff]  ;;  %v427_v50 = vld [vmem:[%s4073_s2 + $0xb0] sm:$0xff]  ;;  %v425_v54 = vld [vmem:[%s4073_s2 + $0xa0] sm:$0xff] }
  0x1d   : > { %777 = vmatprep.mubr.f32.mxu0 %v2827_v6  ;;  %873 = vmatprep.mubr.f32.mxu1 %v2827_v6  ;;  %v383_v51 = vld [vmem:[%s4072_s1 + $0x50] sm:$0xff]  ;;  %v426_v53 = vld [vmem:[%s4073_s2 + $0xa8] sm:$0xff]  ;;  %v384_v55 = vld [vmem:[%s4072_s1 + $0x58] sm:$0xff] }
  0x1e   : > { %v399_v52 = vld [vmem:[%s4072_s1 + $0xd0] sm:$0xff]  ;;  %v400_v56 = vld [vmem:[%s4072_s1 + $0xd8] sm:$0xff]  ;;  %v385_v59 = vld [vmem:[%s4072_s1 + $0x60] sm:$0xff] }
  0x1f   : > { %474 = vperm.xlu1 %2704, %v412_v17   ;;  %469 = vperm.xlu0 %2703, %v411_v18   ;;  %v424_v57 = vld [vmem:[%s4073_s2 + $0x98] sm:$0xff]  ;;  %v423_v58 = vld [vmem:[%s4073_s2 + $0x90] sm:$0xff]  ;;  %v401_v60 = vld [vmem:[%s4072_s1 + $0xe0] sm:$0xff] }
  0x20   : > { %2577 = vmatmul.mubr.msk.f32.gmra.mxu0 %vm599_vm1, %v375_v19  ;;  %2593 = vmatmul.mubr.msk.f32.gmra.mxu1 %vm599_vm1, %v391_v20  ;;  %v422_v61 = vld [vmem:[%s4073_s2 + $0x88] sm:$0xff]  ;;  %v421_v62 = vld [vmem:[%s4073_s2 + $0x80] sm:$0xff]  ;;  %v1101_v1 = vld [vmem:[%s4075_s4 + $0x78] sm:$0xff] }
  0x21   : > { %783 = vmatprep.mubr.f32.mxu0 %v2827_v6  ;;  %879 = vmatprep.mubr.f32.mxu1 %v2827_v6  ;;  %v386_v63 = vld [vmem:[%s4072_s1 + $0x68] sm:$0xff]  ;;  %v1100_v2 = vld [vmem:[%s4075_s4 + $0x70] sm:$0xff]  ;;  %v1098_v7 = vld [vmem:[%s4075_s4 + $0x60] sm:$0xff] }
  0x22   : > { %v402_v0 = vld [vmem:[%s4072_s1 + $0xe8] sm:$0xff]  ;;  %v387_v3 = vld [vmem:[%s4072_s1 + $0x70] sm:$0xff]  ;;  %v388_v8 = vld [vmem:[%s4072_s1 + $0x78] sm:$0xff] }
  0x23   : > { %464 = vperm.xlu1 %2704, %v410_v21   ;;  %459 = vperm.xlu0 %2703, %v409_v22   ;;  %v403_v4 = vld [vmem:[%s4072_s1 + $0xf0] sm:$0xff]  ;;  %v1099_v5 = vld [vmem:[%s4075_s4 + $0x68] sm:$0xff]  ;;  %v404_v9 = vld [vmem:[%s4072_s1 + $0xf8] sm:$0xff] }
  0x24   : > { %2578 = vmatmul.mubr.msk.f32.gmra.mxu0 %vm599_vm1, %v376_v23  ;;  %2594 = vmatmul.mubr.msk.f32.gmra.mxu1 %vm599_vm1, %v392_v24  ;;  %v1097_v10 = vld [vmem:[%s4075_s4 + $0x58] sm:$0xff]  ;;  %v1096_v11 = vld [vmem:[%s4075_s4 + $0x50] sm:$0xff]  ;;  %v1094_v12 = vld [vmem:[%s4075_s4 + $0x40] sm:$0xff] }
  0x25   : > { %789 = vmatprep.mubr.f32.mxu0 %v2827_v6  ;;  %885 = vmatprep.mubr.f32.mxu1 %v2827_v6  ;;  %v1093_v13 = vld [vmem:[%s4075_s4 + $0x38] sm:$0xff]  ;;  %v1092_v14 = vld [vmem:[%s4075_s4 + $0x30] sm:$0xff]  ;;  %v1091_v15 = vld [vmem:[%s4075_s4 + $0x28] sm:$0xff] }
  0x26   : > { %v1090_v16 = vld [vmem:[%s4075_s4 + $0x20] sm:$0xff]  ;;  %v1089_v17 = vld [vmem:[%s4075_s4 + $0x18] sm:$0xff]  ;;  %v1088_v18 = vld [vmem:[%s4075_s4 + $0x10] sm:$0xff] }
  0x27   : > { %454 = vperm.xlu1 %2704, %v408_v25   ;;  %449 = vperm.xlu0 %2703, %v407_v26   ;;  %v1087_v19 = vld [vmem:[%s4075_s4 + $0x8] sm:$0xff]  ;;  %v1086_v20 = vld [vmem:[%s4075_s4] sm:$0xff]  ;;  %v1117_v21 = vld [vmem:[%s4075_s4 + $0xf8] sm:$0xff] }
  0x28   : > { %2579 = vmatmul.mubr.msk.f32.gmra.mxu0 %vm599_vm1, %v377_v27  ;;  %2595 = vmatmul.mubr.msk.f32.gmra.mxu1 %vm599_vm1, %v393_v28  ;;  %v1116_v22 = vld [vmem:[%s4075_s4 + $0xf0] sm:$0xff]  ;;  %v1115_v23 = vld [vmem:[%s4075_s4 + $0xe8] sm:$0xff]  ;;  %v1114_v24 = vld [vmem:[%s4075_s4 + $0xe0] sm:$0xff] }
  0x29   : > { %795 = vmatprep.mubr.f32.mxu0 %v2827_v6  ;;  %891 = vmatprep.mubr.f32.mxu1 %v2827_v6  ;;  %v1113_v25 = vld [vmem:[%s4075_s4 + $0xd8] sm:$0xff]  ;;  %v1112_v26 = vld [vmem:[%s4075_s4 + $0xd0] sm:$0xff]  ;;  %v1111_v27 = vld [vmem:[%s4075_s4 + $0xc8] sm:$0xff] }
  0x2a   : > { %v1110_v28 = vld [vmem:[%s4075_s4 + $0xc0] sm:$0xff] }
  0x2b   : > { %444 = vperm.xlu1 %2704, %v406_v29   ;;  %439 = vperm.xlu0 %2703, %v405_v30   ;;  %v1109_v29 = vld [vmem:[%s4075_s4 + $0xb8] sm:$0xff]  ;;  %v1108_v30 = vld [vmem:[%s4075_s4 + $0xb0] sm:$0xff] }
  0x2c   : > { %2580 = vmatmul.mubr.msk.f32.gmra.mxu0 %vm599_vm1, %v378_v31  ;;  %2596 = vmatmul.mubr.msk.f32.gmra.mxu1 %vm599_vm1, %v394_v32  ;;  %v1107_v31 = vld [vmem:[%s4075_s4 + $0xa8] sm:$0xff]  ;;  %v1106_v32 = vld [vmem:[%s4075_s4 + $0xa0] sm:$0xff] }
  0x2d   : > { %801 = vmatprep.mubr.f32.mxu0 %v2827_v6  ;;  %897 = vmatprep.mubr.f32.mxu1 %v2827_v6 }
  0x2f   : > { %594 = vperm.xlu1 %2704, %v436_v33   ;;  %589 = vperm.xlu0 %2703, %v435_v34   ;;  %v1105_v33 = vld [vmem:[%s4075_s4 + $0x98] sm:$0xff]  ;;  %v1104_v34 = vld [vmem:[%s4075_s4 + $0x90] sm:$0xff] }
  0x30   : > { %2581 = vmatmul.mubr.msk.f32.gmra.mxu0 %vm599_vm1, %v379_v35  ;;  %2597 = vmatmul.mubr.msk.f32.gmra.mxu1 %vm599_vm1, %v395_v36  ;;  %v1103_v35 = vld [vmem:[%s4075_s4 + $0x88] sm:$0xff]  ;;  %v1102_v36 = vld [vmem:[%s4075_s4 + $0x80] sm:$0xff] }
  0x31   : > { %807 = vmatprep.mubr.f32.mxu0 %v2827_v6  ;;  %903 = vmatprep.mubr.f32.mxu1 %v2827_v6 }
  0x33   : > { %584 = vperm.xlu1 %2704, %v434_v37   ;;  %579 = vperm.xlu0 %2703, %v433_v38  }
  0x34   : > { %2582 = vmatmul.mubr.msk.f32.gmra.mxu0 %vm599_vm1, %v380_v39  ;;  %2598 = vmatmul.mubr.msk.f32.gmra.mxu1 %vm599_vm1, %v396_v40  ;;  %v1773_v39 = vld [vmem:[%s4077_s6 + $0x70] sm:$0xff]  ;;  %v1774_v40 = vld [vmem:[%s4077_s6 + $0x78] sm:$0xff] }
  0x35   : > { %813 = vmatprep.mubr.f32.mxu0 %v2827_v6  ;;  %909 = vmatprep.mubr.f32.mxu1 %v2827_v6 }
  0x37   : > { %574 = vperm.xlu1 %2704, %v432_v41   ;;  %569 = vperm.xlu0 %2703, %v431_v42  }
  0x38   : > { %2583 = vmatmul.mubr.msk.f32.gmra.mxu0 %vm599_vm1, %v381_v43  ;;  %2599 = vmatmul.mubr.msk.f32.gmra.mxu1 %vm599_vm1, %v397_v44  ;;  %v1771_v43 = vld [vmem:[%s4077_s6 + $0x60] sm:$0xff]  ;;  %v1772_v44 = vld [vmem:[%s4077_s6 + $0x68] sm:$0xff] }
  0x39   : > { %819 = vmatprep.mubr.f32.mxu0 %v2827_v6  ;;  %915 = vmatprep.mubr.f32.mxu1 %v2827_v6 }
  0x3b   : > { %564 = vperm.xlu1 %2704, %v430_v45   ;;  %559 = vperm.xlu0 %2703, %v429_v46  }
  0x3c   : > { %2584 = vmatmul.mubr.msk.f32.gmra.mxu0 %vm599_vm1, %v382_v47  ;;  %2600 = vmatmul.mubr.msk.f32.gmra.mxu1 %vm599_vm1, %v398_v48  ;;  %v1769_v47 = vld [vmem:[%s4077_s6 + $0x50] sm:$0xff]  ;;  %v1770_v48 = vld [vmem:[%s4077_s6 + $0x58] sm:$0xff] }
  0x3d   : > { %825 = vmatprep.mubr.f32.mxu0 %v2827_v6  ;;  %921 = vmatprep.mubr.f32.mxu1 %v2827_v6 }
  0x3f   : > { %554 = vperm.xlu1 %2704, %v428_v49   ;;  %549 = vperm.xlu0 %2703, %v427_v50  }
  0x40   : > { %2585 = vmatmul.mubr.msk.f32.gmra.mxu0 %vm599_vm1, %v383_v51  ;;  %2601 = vmatmul.mubr.msk.f32.gmra.mxu1 %vm599_vm1, %v399_v52  ;;  %v1767_v51 = vld [vmem:[%s4077_s6 + $0x40] sm:$0xff]  ;;  %v1768_v52 = vld [vmem:[%s4077_s6 + $0x48] sm:$0xff] }
  0x41   : > { %831 = vmatprep.mubr.f32.mxu0 %v2827_v6  ;;  %927 = vmatprep.mubr.f32.mxu1 %v2827_v6 }
  0x43   : > { %544 = vperm.xlu1 %2704, %v426_v53   ;;  %539 = vperm.xlu0 %2703, %v425_v54  }
  0x44   : > { %2586 = vmatmul.mubr.msk.f32.gmra.mxu0 %vm599_vm1, %v384_v55  ;;  %2602 = vmatmul.mubr.msk.f32.gmra.mxu1 %vm599_vm1, %v400_v56  ;;  %v1765_v55 = vld [vmem:[%s4077_s6 + $0x30] sm:$0xff]  ;;  %v1766_v56 = vld [vmem:[%s4077_s6 + $0x38] sm:$0xff] }
  0x45   : > { %837 = vmatprep.mubr.f32.mxu0 %v2827_v6  ;;  %933 = vmatprep.mubr.f32.mxu1 %v2827_v6 }
  0x47   : > { %534 = vperm.xlu1 %2704, %v424_v57   ;;  %529 = vperm.xlu0 %2703, %v423_v58  }
  0x48   : > { %2587 = vmatmul.mubr.msk.f32.gmra.mxu0 %vm599_vm1, %v385_v59  ;;  %2603 = vmatmul.mubr.msk.f32.gmra.mxu1 %vm599_vm1, %v401_v60  ;;  %v1763_v59 = vld [vmem:[%s4077_s6 + $0x20] sm:$0xff]  ;;  %v1764_v60 = vld [vmem:[%s4077_s6 + $0x28] sm:$0xff] }
  0x49   : > { %843 = vmatprep.mubr.f32.mxu0 %v2827_v6  ;;  %939 = vmatprep.mubr.f32.mxu1 %v2827_v6 }
  0x4b   : > { %524 = vperm.xlu1 %2704, %v422_v61   ;;  %519 = vperm.xlu0 %2703, %v421_v62   ;;  %v1761_v62 = vld [vmem:[%s4077_s6 + $0x10] sm:$0xff] }
  0x4c   : > { %2588 = vmatmul.mubr.msk.f32.gmra.mxu0 %vm599_vm1, %v386_v63  ;;  %2604 = vmatmul.mubr.msk.f32.gmra.mxu1 %vm599_vm1, %v402_v0  ;;  %v1762_v63 = vld [vmem:[%s4077_s6 + $0x18] sm:$0xff] }
  0x4d   : > { %849 = vmatprep.mubr.f32.mxu0 %v2827_v6  ;;  %945 = vmatprep.mubr.f32.mxu1 %v2827_v6 }
  0x4f   : > { %1195 = vperm.xlu1 %2704, %v1101_v1   ;;  %1190 = vperm.xlu0 %2703, %v1100_v2   ;;  %v1759_v2 = vld [vmem:[%s4077_s6] sm:$0xff] }
  0x50   : > { %2589 = vmatmul.mubr.msk.f32.gmra.mxu0 %vm599_vm1, %v387_v3  ;;  %2605 = vmatmul.mubr.msk.f32.gmra.mxu1 %vm599_vm1, %v403_v4  ;;  %v1760_v3 = vld [vmem:[%s4077_s6 + $0x8] sm:$0xff] }
  0x51   : > { %855 = vmatprep.mubr.f32.mxu0 %v2827_v6  ;;  %951 = vmatprep.mubr.f32.mxu1 %v2827_v6  ;;  %v1095_v6 = vld [vmem:[%s4075_s4 + $0x48] sm:$0xff] }
  0x53   : > { %1185 = vperm.xlu1 %2704, %v1099_v5   ;;  %1180 = vperm.xlu0 %2703, %v1098_v7   ;;  %v1789_v5 = vld [vmem:[%s4077_s6 + $0xf0] sm:$0xff]  ;;  %v1790_v7 = vld [vmem:[%s4077_s6 + $0xf8] sm:$0xff] }
  0x54   : > { %2590 = vmatmul.mubr.msk.f32.gmra.mxu0 %vm599_vm1, %v388_v8  ;;  %2606 = vmatmul.mubr.msk.f32.gmra.mxu1 %vm599_vm1, %v404_v9  ;;  %v1787_v9 = vld [vmem:[%s4077_s6 + $0xe0] sm:$0xff] }
  0x57   : > { %1175 = vperm.xlu1 %2704, %v1097_v10   ;;  %1170 = vperm.xlu0 %2703, %v1096_v11   ;;  %v1788_v10 = vld [vmem:[%s4077_s6 + $0xe8] sm:$0xff] }
  0x5b   : > { %1165 = vperm.xlu1 %2704, %v1095_v6   ;;  %1160 = vperm.xlu0 %2703, %v1094_v12   ;;  %v1785_v12 = vld [vmem:[%s4077_s6 + $0xd0] sm:$0xff] }
  0x5f   : > { %1155 = vperm.xlu1 %2704, %v1093_v13   ;;  %1150 = vperm.xlu0 %2703, %v1092_v14   ;;  %v1786_v13 = vld [vmem:[%s4077_s6 + $0xd8] sm:$0xff] }
  0x63   : > { %1145 = vperm.xlu1 %2704, %v1091_v15   ;;  %1140 = vperm.xlu0 %2703, %v1090_v16   ;;  %v1783_v15 = vld [vmem:[%s4077_s6 + $0xc0] sm:$0xff]  ;;  %v1784_v16 = vld [vmem:[%s4077_s6 + $0xc8] sm:$0xff] }
  0x67   : > { %1135 = vperm.xlu1 %2704, %v1089_v17   ;;  %1130 = vperm.xlu0 %2703, %v1088_v18   ;;  %v1781_v18 = vld [vmem:[%s4077_s6 + $0xb0] sm:$0xff] }
  0x6b   : > { %1125 = vperm.xlu1 %2704, %v1087_v19   ;;  %1120 = vperm.xlu0 %2703, %v1086_v20   ;;  %v1782_v19 = vld [vmem:[%s4077_s6 + $0xb8] sm:$0xff] }
  0x6f   : > { %1275 = vperm.xlu1 %2704, %v1117_v21   ;;  %1270 = vperm.xlu0 %2703, %v1116_v22   ;;  %v1779_v22 = vld [vmem:[%s4077_s6 + $0xa0] sm:$0xff] }
  0x73   : > { %1265 = vperm.xlu1 %2704, %v1115_v23   ;;  %1260 = vperm.xlu0 %2703, %v1114_v24   ;;  %v1780_v23 = vld [vmem:[%s4077_s6 + $0xa8] sm:$0xff] }
  0x77   : > { %1255 = vperm.xlu1 %2704, %v1113_v25   ;;  %1250 = vperm.xlu0 %2703, %v1112_v26   ;;  %v1777_v25 = vld [vmem:[%s4077_s6 + $0x90] sm:$0xff]  ;;  %v1778_v26 = vld [vmem:[%s4077_s6 + $0x98] sm:$0xff] }
  0x7b   : > { %1245 = vperm.xlu1 %2704, %v1111_v27   ;;  %1240 = vperm.xlu0 %2703, %v1110_v28   ;;  %v1775_v28 = vld [vmem:[%s4077_s6 + $0x80] sm:$0xff] }
  0x7f   : > { %1235 = vperm.xlu1 %2704, %v1109_v29   ;;  %1230 = vperm.xlu0 %2703, %v1108_v30   ;;  %v1776_v29 = vld [vmem:[%s4077_s6 + $0x88] sm:$0xff] }
  0x83   : > { %1225 = vperm.xlu1 %2704, %v1107_v31   ;;  %1220 = vperm.xlu0 %2703, %v1106_v32   ;;  %v2369_v32 = vld [vmem:[#allocation2] sm:$0x1] }
  0x87   : > { %1215 = vperm.xlu1 %2704, %v1105_v33   ;;  %1210 = vperm.xlu0 %2703, %v1104_v34  }
  0x8a   : > { %v3258_v37 = vpop.permute.xlu0 %509  ;;  %v3260_v38 = vpop.permute.xlu1 %499 }
  0x8b   : > { %1205 = vperm.xlu1 %2704, %v1103_v35   ;;  %1200 = vperm.xlu0 %2703, %v1102_v36  }
  0x8e   : > { %v3268_v41 = vpop.permute.xlu0 %514  ;;  %v3270_v42 = vpop.permute.xlu1 %504 }
  0x8f   : > { %1863 = vperm.xlu1 %2704, %v1773_v39   ;;  %1868 = vperm.xlu0 %2703, %v1774_v40  }
  0x92   : > { %v3278_v45 = vpop.permute.xlu1 %494  ;;  %v3280_v46 = vpop.permute.xlu0 %489 }
  0x93   : > { %1853 = vperm.xlu1 %2704, %v1771_v43   ;;  %1858 = vperm.xlu0 %2703, %v1772_v44  }
  0x96   : > { %v3288_v49 = vpop.permute.xlu1 %484  ;;  %v3290_v50 = vpop.permute.xlu0 %479 }
  0x97   : > { %1843 = vperm.xlu1 %2704, %v1769_v47   ;;  %1848 = vperm.xlu0 %2703, %v1770_v48  }
  0x9a   : > { %v3298_v53 = vpop.permute.xlu1 %474  ;;  %v3300_v54 = vpop.permute.xlu0 %469 }
  0x9b   : > { %1833 = vperm.xlu1 %2704, %v1767_v51   ;;  %1838 = vperm.xlu0 %2703, %v1768_v52   ;;  %v2708_v51 = vld [vmem:[%s4074_s3 + $0x4] ss:$8 sps:$4 sm:$0xff]  }
  0x9c   : > { %1470 = vmatprep.mubr.bf16.mxu1 %v2708_v51 }
  0x9e   : > { %v3308_v57 = vpop.permute.xlu0 %459  ;;  %v3310_v58 = vpop.permute.xlu1 %464 }
  0x9f   : > { %1823 = vperm.xlu1 %2704, %v1765_v55   ;;  %1828 = vperm.xlu0 %2703, %v1766_v56  }
  0xa2   : > { %v3318_v61 = vpop.permute.xlu0 %449  ;;  %v3326_v0 = vpop.permute.xlu1 %454 }
  0xa3   : > { %1813 = vperm.xlu1 %2704, %v1763_v59   ;;  %1818 = vperm.xlu0 %2703, %v1764_v60  }
  0xa6   : > { %v3328_v1 = vpop.permute.xlu0 %439  ;;  %v3336_v4 = vpop.permute.xlu1 %444 }
  0xa7   : > { %1803 = vperm.xlu1 %2704, %v1761_v62   ;;  %1808 = vperm.xlu0 %2703, %v1762_v63  }
  0xaa   : > { %v3344_v8 = vpop.permute.xlu0 %589  ;;  %v3352_v11 = vpop.permute.xlu1 %594 }
  0xab   : > { %1793 = vperm.xlu1 %2704, %v1759_v2   ;;  %1798 = vperm.xlu0 %2703, %v1760_v3  }
  0xae   : > { %v3354_v6 = vpop.permute.xlu0 %579  ;;  %v3362_v14 = vpop.permute.xlu1 %584 }
  0xaf   : > { %1943 = vperm.xlu1 %2704, %v1789_v5   ;;  %1948 = vperm.xlu0 %2703, %v1790_v7  }
  0xb2   : > { %v3370_v17 = vpop.permute.xlu0 %569  ;;  %v3378_v20 = vpop.permute.xlu1 %574 }
  0xb3   : > { %1933 = vperm.xlu1 %2704, %v1787_v9   ;;  %1938 = vperm.xlu0 %2703, %v1788_v10  }
  0xb6   : > { %v3380_v21 = vpop.permute.xlu0 %559  ;;  %v3388_v24 = vpop.permute.xlu1 %564 }
  0xb7   : > { %1923 = vperm.xlu1 %2704, %v1785_v12   ;;  %1928 = vperm.xlu0 %2703, %v1786_v13   ;;  %4092 = vst [vmem:[#allocation3_spill] sm:$0xff] %v3388_v24 }
  0xba   : > { %v3396_v27 = vpop.permute.xlu0 %549  ;;  %v3404_v30 = vpop.permute.xlu1 %554 }
  0xbb   : > { %1913 = vperm.xlu1 %2704, %v1783_v15   ;;  %1918 = vperm.xlu0 %2703, %v1784_v16   ;;  %4093 = vst [vmem:[#allocation4_spill] sm:$0xff] %v3396_v27  ;;  %4094 = vst [vmem:[#allocation5_spill] sm:$0xff] %v3404_v30 }
  0xbe   : > { %v3406_v31 = vpop.permute.xlu0 %539  ;;  %v3408_v33 = vpop.permute.xlu1 %544 }
  0xbf   : > { %1903 = vperm.xlu1 %2704, %v1781_v18   ;;  %1908 = vperm.xlu0 %2703, %v1782_v19   ;;  %4095 = vst [vmem:[#allocation6_spill] sm:$0xff] %v3406_v31  ;;  %4096 = vst [vmem:[#allocation7_spill] sm:$0xff] %v3408_v33 }
  0xc2   : > { %v530_v34 = vpop.permute.xlu0 %529  ;;  %v535_v35 = vpop.permute.xlu1 %534 }
  0xc3   : > { %1893 = vperm.xlu1 %2704, %v1779_v22   ;;  %1898 = vperm.xlu0 %2703, %v1780_v23  }
  0xc6   : > { %v520_v36 = vpop.permute.xlu0 %519  ;;  %v525_v52 = vpop.permute.xlu1 %524 }
  0xc7   : > { %1883 = vperm.xlu1 %2704, %v1777_v25   ;;  %1888 = vperm.xlu0 %2703, %v1778_v26  }
  0xcb   : > { %1873 = vperm.xlu1 %2704, %v1775_v28   ;;  %1878 = vperm.xlu0 %2703, %v1776_v29  }
  0xcf   : > { %2372 = vperm.xlu0 %2703, %v2369_v32  }
  0xd8   : > { %v767_v39 = vpop.f32.mrf.mxu0  ;;  %v863_v40 = vpop.f32.mrf.mxu1 }
  0xd9   : > { %v864_v43 = vadd.f32 %v863_v40, %v520_v36  ;;  %v768_v44 = vadd.f32 %v767_v39, %v3328_v1 }
  0xda   : > { %v769_v47 = vpop.f32.mrf.mxu0  ;;  %v865_v48 = vpop.f32.mrf.mxu1 }
  0xdb   : > { %v866_v55 = vadd.f32 %v865_v48, %v520_v36  ;;  %v770_v56 = vadd.f32 %v769_v47, %v3328_v1  ;;  %v990_v62 = vmax.f32 %v864_v43, 0.0  ;;  %v958_v3 = vmax.f32 %v768_v44, 0.0 }
  0xdc   : > { %v773_v59 = vpop.f32.mrf.mxu0  ;;  %v869_v60 = vpop.f32.mrf.mxu1 }
  0xdd   : > { %v774_v63 = vadd.f32 %v773_v59, %v3336_v4  ;;  %v870_v2 = vadd.f32 %v869_v60, %v525_v52  ;;  %v991_v5 = vmax.f32 %v866_v55, 0.0  ;;  %v959_v16 = vmax.f32 %v770_v56, 0.0 }
  0xde   : > { %v775_v7 = vpop.f32.mrf.mxu0  ;;  %v871_v9 = vpop.f32.mrf.mxu1 }
  0xdf   : > { %v960_v10 = vmax.f32 %v774_v63, 0.0  ;;  %v992_v12 = vmax.f32 %v870_v2, 0.0  ;;  %v776_v13 = vadd.f32 %v775_v7, %v3336_v4  ;;  %v872_v15 = vadd.f32 %v871_v9, %v525_v52 }
  0xe0   : > { %v779_v18 = vpop.f32.mrf.mxu0  ;;  %v875_v19 = vpop.f32.mrf.mxu1 }
  0xe1   : > { %v3417_v1 = vpack.c.bf16 %v960_v10, %v958_v3  ;;  %v3419_v22 = vpack.c.bf16 %v992_v12, %v990_v62  ;;  %v961_v23 = vmax.f32 %v776_v13, 0.0  ;;  %v993_v25 = vmax.f32 %v872_v15, 0.0 }
  0xe2   : > { %v780_v26 = vadd.f32 %v779_v18, %v3318_v61  ;;  %v876_v28 = vadd.f32 %v875_v19, %v530_v34  ;;  %v781_v29 = vpop.f32.mrf.mxu0  ;;  %v877_v32 = vpop.f32.mrf.mxu1 }
  0xe3   : > { %4097 = vst [vmem:[#allocation8_spill] sm:$0xff] %v3419_v22  ;;  %v3422_v36 = vpack.c.bf16 %v961_v23, %v959_v16  ;;  %v3424_v39 = vpack.c.bf16 %v993_v25, %v991_v5  ;;  %v878_v4 = vadd.f32 %v877_v32, %v530_v34  ;;  %v782_v40 = vadd.f32 %v781_v29, %v3318_v61 }
  0xe4   : > { %v785_v43 = vpop.f32.mrf.mxu0  ;;  %v881_v44 = vpop.f32.mrf.mxu1  ;;  %v994_v47 = vmax.f32 %v876_v28, 0.0  ;;  %v962_v52 = vmax.f32 %v780_v26, 0.0 }
  0xe5   : > { %4098 = vst [vmem:[#allocation9_spill] sm:$0xff] %v3424_v39  ;;  %v786_v48 = vadd.f32 %v785_v43, %v3326_v0  ;;  %v882_v51 = vadd.f32 %v881_v44, %v535_v35  ;;  %v995_v55 = vmax.f32 %v878_v4, 0.0  ;;  %v963_v3 = vmax.f32 %v782_v40, 0.0 }
  0xe6   : > { %v787_v56 = vpop.f32.mrf.mxu0  ;;  %v883_v59 = vpop.f32.mrf.mxu1 }
  0xe7   : > { %v964_v60 = vmax.f32 %v786_v48, 0.0  ;;  %v996_v62 = vmax.f32 %v882_v51, 0.0  ;;  %v788_v63 = vadd.f32 %v787_v56, %v3326_v0  ;;  %v884_v2 = vadd.f32 %v883_v59, %v535_v35 }
  0xe8   : > { %v3429_v5 = vpop.f32.mrf.mxu0  ;;  %v887_v34 = vpop.f32.mrf.mxu1 }
  0xe9   : > { %v3431_v61 = vpack.c.bf16 %v964_v60, %v962_v52  ;;  %v3433_v7 = vpack.c.bf16 %v996_v62, %v994_v47  ;;  %v965_v9 = vmax.f32 %v788_v63, 0.0  ;;  %v997_v10 = vmax.f32 %v884_v2, 0.0 }
  0xea   : > { %v888_v12 = vadd.f32 %v887_v34, %v3406_v31  ;;  %v3436_v13 = vpop.f32.mrf.mxu0  ;;  %v3438_v15 = vpop.f32.mrf.mxu1 }
  0xeb   : > { %4099 = vst [vmem:[#allocation10_spill] sm:$0xff] %v3433_v7  ;;  %4100 = vst [vmem:[#allocation11_spill] sm:$0xff] %v3438_v15  ;;  %v3440_v16 = vpack.c.bf16 %v965_v9, %v963_v3  ;;  %v3442_v0 = vpack.c.bf16 %v997_v10, %v995_v55 }
  0xec   : > { %v3444_v35 = vpop.f32.mrf.mxu0  ;;  %v893_v18 = vpop.f32.mrf.mxu1  ;;  %v998_v19 = vmax.f32 %v888_v12, 0.0 }
  0xed   : > { %4101 = vst [vmem:[#allocation12_spill] sm:$0xff] %v3442_v0  ;;  %v894_v23 = vadd.f32 %v893_v18, %v3408_v33 }
  0xee   : > { %v3447_v25 = vpop.f32.mrf.mxu0  ;;  %v3449_v26 = vpop.f32.mrf.mxu1 }
  0xef   : > { %4102 = vst [vmem:[#allocation13_spill] sm:$0xff] %v3449_v26  ;;  %v1000_v28 = vmax.f32 %v894_v23, 0.0 }
  0xf0   : > { %v3451_v29 = vpop.f32.mrf.mxu0  ;;  %v3453_v32 = vpop.f32.mrf.mxu1 }
  0xf1   : > { %4103 = vst [vmem:[#allocation14_spill] sm:$0xff] %v3453_v32  ;;  %v3455_v4 = vpack.c.bf16 %v1000_v28, %v998_v19 }
  0xf2   : > { %v3457_v40 = vpop.f32.mrf.mxu0  ;;  %v3459_v43 = vpop.f32.mrf.mxu1 }
  0xf3   : > { %4104 = vst [vmem:[#allocation15_spill] sm:$0xff] %v3455_v4  ;;  %4105 = vst [vmem:[#allocation16_spill] sm:$0xff] %v3459_v43 }
  0xf4   : > { %v3461_v44 = vpop.f32.mrf.mxu0  ;;  %v3463_v47 = vpop.f32.mrf.mxu1 }
  0xf5   : > { %4106 = vst [vmem:[#allocation17_spill] sm:$0xff] %v3463_v47 }
  0xf6   : > { %v3465_v48 = vpop.f32.mrf.mxu0  ;;  %v3467_v51 = vpop.f32.mrf.mxu1 }
  0xf7   : > { %4107 = vst [vmem:[#allocation18_spill] sm:$0xff] %v3467_v51 }
  0xf8   : > { %v3469_v52 = vpop.f32.mrf.mxu0  ;;  %v3471_v55 = vpop.f32.mrf.mxu1 }
  0xf9   : > { %4108 = vst [vmem:[#allocation19_spill] sm:$0xff] %v3471_v55 }
  0xfa   : > { %v817_v56 = vpop.f32.mrf.mxu0  ;;  %v3473_v59 = vpop.f32.mrf.mxu1 }
  0xfb   : > { %4109 = vst [vmem:[#allocation20_spill] sm:$0xff] %v3473_v59 }
  0xfc   : > { %v821_v60 = vpop.f32.mrf.mxu0  ;;  %v3475_v62 = vpop.f32.mrf.mxu1 }
  0xfd   : > { %4110 = vst [vmem:[#allocation21_spill] sm:$0xff] %v3475_v62 }
  0xfe   : > { %v823_v63 = vpop.f32.mrf.mxu0  ;;  %v3477_v2 = vpop.f32.mrf.mxu1 }
  0xff   : > { %4111 = vst [vmem:[#allocation22_spill] sm:$0xff] %v3477_v2 }
 0x100   : > { %v827_v3 = vpop.f32.mrf.mxu0  ;;  %v3479_v34 = vpop.f32.mrf.mxu1 }
 0x101   : > { %4112 = vst [vmem:[#allocation23_spill] sm:$0xff] %v3479_v34 }
 0x102   : > { %v829_v9 = vpop.f32.mrf.mxu0  ;;  %v3481_v12 = vpop.f32.mrf.mxu1 }
 0x104   : > { %v833_v10 = vpop.f32.mrf.mxu0  ;;  %v3483_v23 = vpop.f32.mrf.mxu1 }
 0x105   : > { %4113 = vst [vmem:[#allocation24_spill] sm:$0xff] %v3483_v23 }
 0x106   : > { %v835_v18 = vpop.f32.mrf.mxu0  ;;  %v3485_v39 = vpop.f32.mrf.mxu1 }
 0x107   : > { %v836_v2 = vadd.f32 %v835_v18, %v3278_v45 }
 0x108   : > { %v839_v19 = vpop.f32.mrf.mxu0  ;;  %v3487_v4 = vpop.f32.mrf.mxu1 }
 0x10a   : > { %v841_v28 = vpop.f32.mrf.mxu0  ;;  %v3492_v31 = vpop.f32.mrf.mxu1 }
 0x10b   : > { %v842_v62 = vadd.f32 %v841_v28, %v3260_v38  ;;  %v834_v28 = vadd.f32 %v833_v10, %v3278_v45 }
 0x10c   : > { %v845_v22 = vpop.f32.mrf.mxu0 }
 0x10d   : > { %v846_v43 = vadd.f32 %v845_v22, %v3270_v42  ;;  %v981_v22 = vmax.f32 %v836_v2, 0.0 }
 0x10e   : > { %v847_v7 = vpop.f32.mrf.mxu0 }
 0x10f   : > { %v848_v47 = vadd.f32 %v847_v7, %v3270_v42  ;;  %v824_v42 = vadd.f32 %v823_v63, %v3288_v49 }
 0x110   : > { %v851_v0 = vpop.f32.mrf.mxu0 }
 0x111   : > { %v852_v51 = vadd.f32 %v851_v0, %v3258_v37  ;;  %v985_v24 = vmax.f32 %v848_v47, 0.0  ;;  %v983_v0 = vmax.f32 %v842_v62, 0.0  ;;  %v822_v62 = vadd.f32 %v821_v60, %v3288_v49 }
 0x112   : > { %v853_v26 = vpop.f32.mrf.mxu0  ;;  %v810_v49 = vadd.f32 %v3461_v44, %v3298_v53 }
 0x113   : > { %v854_v32 = vadd.f32 %v853_v26, %v3258_v37  ;;  %v840_v26 = vadd.f32 %v839_v19, %v3260_v38  ;;  %v986_v34 = vmax.f32 %v852_v51, 0.0  ;;  %v830_v37 = vadd.f32 %v829_v9, %v3280_v46 }
 0x114   : > { %v857_v33 = vpop.f32.mrf.mxu0  ;;  %v818_v51 = vadd.f32 %v817_v56, %v3290_v50  ;;  %v980_v9 = vmax.f32 %v834_v28, 0.0  ;;  %v806_v56 = vadd.f32 %v3457_v40, %v3300_v54  ;;  %v976_v60 = vmax.f32 %v822_v62, 0.0 }
 0x115   : > { %v858_v15 = vadd.f32 %v857_v33, %v3268_v41  ;;  %v987_v7 = vmax.f32 %v854_v32, 0.0  ;;  %v3500_v33 = vpop.f32.mrf.mxu1  ;;  %v828_v32 = vadd.f32 %v827_v3, %v3280_v46  ;;  %v982_v47 = vmax.f32 %v840_v26, 0.0 }
 0x116   : > { %v859_v30 = vpop.f32.mrf.mxu0  ;;  %v975_v2 = vmax.f32 %v818_v51, 0.0  ;;  %v794_v40 = vadd.f32 %v3436_v13, %v3308_v57  ;;  %v971_v19 = vmax.f32 %v806_v56, 0.0  ;;  %v972_v44 = vmax.f32 %v810_v49, 0.0  ;;  %v4120_v56 = vld [vmem:[#allocation16_spill] sm:$0xff]  ;;  %v4121_v49 = vld [vmem:[#allocation19_spill] sm:$0xff] }
 0x117   : > { %v860_v55 = vadd.f32 %v859_v30, %v3268_v41  ;;  %v988_v27 = vmax.f32 %v858_v15, 0.0  ;;  %v984_v41 = vmax.f32 %v846_v43, 0.0  ;;  %v1035_v15 = vpack.c.bf16 %v985_v24, %v983_v0  ;;  %v943_v38 = vpop.f32.mrf.mxu1 }
 0x118   : > { %v977_v43 = vmax.f32 %v824_v42, 0.0  ;;  %v816_v24 = vadd.f32 %v3469_v52, %v3290_v50  ;;  %v978_v46 = vmax.f32 %v828_v32, 0.0  ;;  %v804_v50 = vadd.f32 %v3451_v29, %v3300_v54 }
 0x119   : > { %v989_v23 = vmax.f32 %v860_v55, 0.0  ;;  %v1036_v30 = vpack.c.bf16 %v988_v27, %v986_v34  ;;  %v979_v55 = vmax.f32 %v830_v37, 0.0  ;;  %v1034_v45 = vpack.c.bf16 %v984_v41, %v982_v47 }
 0x11a   : > { %v812_v27 = vadd.f32 %v3465_v48, %v3298_v53  ;;  %v1032_v3 = vpack.c.bf16 %v980_v9, %v978_v46  ;;  %v800_v48 = vadd.f32 %v3447_v25, %v3310_v58  ;;  %v1031_v10 = vpack.c.bf16 %v977_v43, %v975_v2  ;;  %v4118_v43 = vld [vmem:[#allocation22_spill] sm:$0xff] }
 0x11b   : > { %v1037_v59 = vpack.c.bf16 %v989_v23, %v987_v7  ;;  %v1033_v63 = vpack.c.bf16 %v981_v22, %v979_v55  ;;  %v974_v52 = vmax.f32 %v816_v24, 0.0  ;;  %v798_v53 = vadd.f32 %v3444_v35, %v3310_v58 }
 0x11c   : > { %v973_v34 = vmax.f32 %v812_v27, 0.0  ;;  %v969_v7 = vmax.f32 %v800_v48, 0.0  ;;  %v792_v26 = vadd.f32 %v3429_v5, %v3308_v57  ;;  %v970_v37 = vmax.f32 %v804_v50, 0.0  ;;  %v4124_v50 = vld [vmem:[#allocation18_spill] sm:$0xff] }
 0x11d   : > { %1438 = vmatprep.subr.bf16.mxu1 %v1037_v59  ;;  %v947_v59 = vpop.f32.mrf.mxu1  ;;  %v1030_v23 = vpack.c.bf16 %v976_v60, %v974_v52  ;;  %v967_v29 = vmax.f32 %v794_v40, 0.0  ;;  %v968_v0 = vmax.f32 %v798_v53, 0.0  ;;  %v938_v5 = vadd.f32 %v3492_v31, %v3354_v6  ;;  %v4122_v60 = vld [vmem:[#allocation21_spill] sm:$0xff]  ;;  %v4125_v53 = vld [vmem:[#allocation6_spill] sm:$0xff] }
 0x11e   : > { %1439 = vmatpush1.bf16.msra.mxu1 %v1036_v30  ;;  %v1029_v25 = vpack.c.bf16 %v973_v34, %v971_v19  ;;  %v1028_v28 = vpack.c.bf16 %v972_v44, %v970_v37  ;;  %v966_v41 = vmax.f32 %v792_v26, 0.0  ;;  %v944_v22 = vadd.f32 %v943_v38, %v3362_v14  ;;  %v4126_v44 = vld [vmem:[#allocation11_spill] sm:$0xff] }
 0x11f   : > { %1440 = vmatprep.subr.bf16.mxu1 %v1035_v15  ;;  %v949_v18 = vpop.f32.mrf.mxu1  ;;  %v1027_v13 = vpack.c.bf16 %v969_v7, %v967_v29  ;;  %v948_v32 = vadd.f32 %v947_v59, %v3344_v8  ;;  %v926_v51 = vadd.f32 %v3481_v12, %v3370_v17  ;;  %v932_v38 = vadd.f32 %v3485_v39, %v3378_v20  ;;  %v4115_v12 = vld [vmem:[#allocation23_spill] sm:$0xff]  ;;  %v4127_v7 = vld [vmem:[#allocation14_spill] sm:$0xff] }
 0x120   : > { %v1026_v58 = vpack.c.bf16 %v968_v0, %v966_v41  ;;  %v950_v42 = vadd.f32 %v949_v18, %v3344_v8  ;;  %v1015_v55 = vmax.f32 %v938_v5, 0.0  ;;  %v1017_v8 = vmax.f32 %v944_v22, 0.0  ;;  %v4117_v39 = vld [vmem:[#allocation3_spill] sm:$0xff] }
 0x121   : > { %v953_v54 = vpop.f32.mrf.mxu1  ;;  %v1011_v24 = vmax.f32 %v926_v51, 0.0  ;;  %v1013_v46 = vmax.f32 %v932_v38, 0.0  ;;  %v4129_v0 = vld [vmem:[#allocation7_spill] sm:$0xff] }
 0x122   : > { %1441 = vmatpush1.bf16.msra.mxu1 %v1034_v45  ;;  %v954_v57 = vadd.f32 %v953_v54, %v3352_v11  ;;  %v1019_v47 = vmax.f32 %v950_v42, 0.0  ;;  %v924_v45 = vadd.f32 %v4115_v12, %v3370_v17  ;;  %v1051_v59 = vpack.c.bf16 %v1017_v8, %v1015_v55  ;;  %v4131_v51 = vld [vmem:[#allocation15_spill] sm:$0xff]  ;;  %v4135_v55 = vld [vmem:[#allocation8_spill] sm:$0xff]  ;;  %v2709_v8 = vld [vmem:[%s4074_s3 + $0x14] ss:$8 sps:$4 sm:$0xff]  }
 0x123   : > { %1442 = vmatprep.subr.bf16.mxu1 %v1033_v63  ;;  %v955_v30 = vpop.f32.mrf.mxu1  ;;  %v920_v63 = vadd.f32 %v4118_v43, %v4117_v39  ;;  %v912_v17 = vadd.f32 %v4121_v49, %v3380_v21  ;;  %v1049_v19 = vpack.c.bf16 %v1013_v46, %v1011_v24  ;;  %v2706_v38 = vld [vmem:[%s4074_s3] ss:$8 sps:$4 sm:$0xff]   ;;  %v2717_v12 = vld [vmem:[%s4074_s3 + $0x30] ss:$8 sps:$4 sm:$0xff]   ;;  %v2733_v46 = vld [vmem:[%s4074_s3 + $0x94] ss:$8 sps:$4 sm:$0xff]  }
 0x124   : > { %v956_v35 = vadd.f32 %v955_v30, %v3352_v11  ;;  %v942_v11 = vadd.f32 %v3500_v33, %v3362_v14  ;;  %v1020_v31 = vmax.f32 %v954_v57, 0.0  ;;  %v2729_v43 = vld [vmem:[%s4074_s3 + $0x70] ss:$8 sps:$4 sm:$0xff]   ;;  %v2732_v24 = vld [vmem:[%s4074_s3 + $0x80] ss:$8 sps:$4 sm:$0xff]  }
 0x125   : > { %v1009_v40 = vmax.f32 %v920_v63, 0.0  ;;  %v1006_v37 = vmax.f32 %v912_v17, 0.0  ;;  %v2730_v63 = vld [vmem:[%s4074_s3 + $0x84] ss:$8 sps:$4 sm:$0xff]   ;;  %v2741_v49 = vld [vmem:[%s4074_s3 + $0xb0] ss:$8 sps:$4 sm:$0xff]  }
 0x126   : > { %1443 = vmatpush1.bf16.msra.mxu1 %v1032_v3  ;;  %v1021_v15 = vmax.f32 %v956_v35, 0.0  ;;  %v1016_v33 = vmax.f32 %v942_v11, 0.0  ;;  %v1010_v3 = vmax.f32 %v924_v45, 0.0  ;;  %v4133_v11 = vld [vmem:[#allocation10_spill] sm:$0xff]  ;;  %v2718_v45 = vld [vmem:[%s4074_s3 + $0x44] ss:$8 sps:$4 sm:$0xff]  }
 0x127   : > { %1444 = vmatprep.subr.bf16.mxu1 %v1031_v10  ;;  %v4123_v10 = vld [vmem:[#allocation5_spill] sm:$0xff]  ;;  %v2742_v17 = vld [vmem:[%s4074_s3 + $0xc4] ss:$8 sps:$4 sm:$0xff]  }
 0x128   : > { %v1053_v62 = vpack.c.bf16 %v1021_v15, %v1019_v47  ;;  %v908_v52 = vadd.f32 %v4124_v50, %v4123_v10  ;;  %v2753_v50 = vld [vmem:[%s4074_s3 + $0xf0] ss:$8 sps:$4 sm:$0xff]  }
 0x12a   : > { %1445 = vmatpush1.bf16.msra.mxu1 %v1030_v23  ;;  %v890_v23 = vadd.f32 %v4126_v44, %v4125_v53  ;;  %v1005_v30 = vmax.f32 %v908_v52, 0.0  ;;  %v3667_v52 = vpop.permute.xlu0 %1190 }
 0x12b   : > { %1446 = vmatprep.subr.bf16.mxu1 %v1029_v25  ;;  %v4128_v25 = vld [vmem:[#allocation17_spill] sm:$0xff] }
 0x12c   : > { %v906_v26 = vadd.f32 %v4128_v25, %v4123_v10  ;;  %v999_v5 = vmax.f32 %v890_v23, 0.0  ;;  %v2751_v10 = vld [vmem:[%s4074_s3 + $0xf4] ss:$8 sps:$4 sm:$0xff]  }
 0x12e   : > { %1447 = vmatpush1.bf16.msra.mxu1 %v1028_v28  ;;  %v4130_v28 = vld [vmem:[#allocation13_spill] sm:$0xff]  ;;  %v1004_v42 = vmax.f32 %v906_v26, 0.0 }
 0x12f   : > { %1448 = vmatprep.subr.bf16.mxu1 %v1027_v13  ;;  %v896_v13 = vadd.f32 %v4130_v28, %v4129_v0 }
 0x131   : > { %v1001_v22 = vmax.f32 %v896_v13, 0.0 }
 0x132   : > { %1449 = vmatpush1.bf16.msra.mxu1 %v1026_v58 }
 0x133   : > { %1450 = vmatprep.subr.bf16.mxu1 %v3440_v16  ;;  %v936_v16 = vadd.f32 %v3487_v4, %v3354_v6  ;;  %v4116_v6 = vld [vmem:[#allocation24_spill] sm:$0xff]  ;;  %v1043_v47 = vpack.c.bf16 %v1001_v22, %v999_v5 }
 0x134   : > { %v930_v14 = vadd.f32 %v4116_v6, %v3378_v20  ;;  %v918_v20 = vadd.f32 %v4122_v60, %v4117_v39  ;;  %v2720_v6 = vld [vmem:[%s4074_s3 + $0x40] ss:$8 sps:$4 sm:$0xff]   ;;  %v2727_v39 = vld [vmem:[%s4074_s3 + $0x74] ss:$8 sps:$4 sm:$0xff]  }
 0x135   : > { %v1014_v4 = vmax.f32 %v936_v16, 0.0  ;;  %v4132_v16 = vld [vmem:[#allocation12_spill] sm:$0xff] }
 0x136   : > { %1451 = vmatpush1.bf16.msra.mxu1 %v3431_v61  ;;  %v1018_v61 = vmax.f32 %v948_v32, 0.0  ;;  %v1012_v48 = vmax.f32 %v930_v14, 0.0  ;;  %v1008_v54 = vmax.f32 %v918_v20, 0.0  ;;  %v2721_v14 = vld [vmem:[%s4074_s3 + $0x54] ss:$8 sps:$4 sm:$0xff]  }
 0x137   : > { %1452 = vmatprep.subr.bf16.mxu1 %v3422_v36  ;;  %v4114_v36 = vld [vmem:[#allocation20_spill] sm:$0xff]  ;;  %v1050_v34 = vpack.c.bf16 %v1016_v33, %v1014_v4  ;;  %v2745_v20 = vld [vmem:[%s4074_s3 + $0xd4] ss:$8 sps:$4 sm:$0xff]  }
 0x138   : > { %v914_v9 = vadd.f32 %v4114_v36, %v3380_v21  ;;  %v1052_v27 = vpack.c.bf16 %v1020_v31, %v1018_v61  ;;  %v1048_v29 = vpack.c.bf16 %v1012_v48, %v1010_v3  ;;  %v1046_v57 = vpack.c.bf16 %v1008_v54, %v1006_v37  ;;  %v4134_v31 = vld [vmem:[#allocation9_spill] sm:$0xff]  ;;  %v2712_v61 = vld [vmem:[%s4074_s3 + $0x24] ss:$8 sps:$4 sm:$0xff]   ;;  %v2714_v36 = vld [vmem:[%s4074_s3 + $0x20] ss:$8 sps:$4 sm:$0xff]  }
 0x139   : > { %v2723_v4 = vld [vmem:[%s4074_s3 + $0x50] ss:$8 sps:$4 sm:$0xff]   ;;  %v2724_v33 = vld [vmem:[%s4074_s3 + $0x64] ss:$8 sps:$4 sm:$0xff]   ;;  %v2744_v60 = vld [vmem:[%s4074_s3 + $0xc0] ss:$8 sps:$4 sm:$0xff]  }
 0x13a   : > { %1453 = vmatpush1.bf16.msra.mxu1 %v3417_v1  ;;  %v4119_v1 = vld [vmem:[#allocation4_spill] sm:$0xff]  ;;  %v1007_v18 = vmax.f32 %v914_v9, 0.0  ;;  %v2715_v9 = vld [vmem:[%s4074_s3 + $0x34] ss:$8 sps:$4 sm:$0xff]  }
 0x13b   : > { %1454 = vmatprep.subr.bf16.mxu1 %v1053_v62  ;;  %v902_v2 = vadd.f32 %v4120_v56, %v4119_v1  ;;  %v900_v21 = vadd.f32 %v4127_v7, %v4119_v1  ;;  %v2711_v62 = vld [vmem:[%s4074_s3 + $0x10] ss:$8 sps:$4 sm:$0xff]   ;;  %v2736_v1 = vld [vmem:[%s4074_s3 + $0xa4] ss:$8 sps:$4 sm:$0xff]   ;;  %v2738_v56 = vld [vmem:[%s4074_s3 + $0xa0] ss:$8 sps:$4 sm:$0xff]  }
 0x13c   : > { %v1047_v58 = vpack.c.bf16 %v1009_v40, %v1007_v18  ;;  %v2747_v3 = vld [vmem:[%s4074_s3 + $0xd0] ss:$8 sps:$4 sm:$0xff]   ;;  %v2748_v48 = vld [vmem:[%s4074_s3 + $0xe4] ss:$8 sps:$4 sm:$0xff]   ;;  %v3669_v18 = vpop.permute.xlu1 %1195  ;;  %v3671_v40 = vpop.permute.xlu0 %1180 }
 0x13d   : > { %v1003_v41 = vmax.f32 %v902_v2, 0.0  ;;  %v1002_v35 = vmax.f32 %v900_v21, 0.0  ;;  %v2739_v2 = vld [vmem:[%s4074_s3 + $0xb4] ss:$8 sps:$4 sm:$0xff]  }
 0x13e   : > { %1455 = vmatpush2.bf16.msra.mxu1 %v1052_v27  ;;  %v2726_v27 = vld [vmem:[%s4074_s3 + $0x60] ss:$8 sps:$4 sm:$0xff]  }
 0x13f   : > { %1456 = vmatprep.subr.bf16.mxu1 %v1051_v59  ;;  %v1045_v15 = vpack.c.bf16 %v1005_v30, %v1003_v41  ;;  %v1044_v32 = vpack.c.bf16 %v1004_v42, %v1002_v35  ;;  %v2735_v59 = vld [vmem:[%s4074_s3 + $0x90] ss:$8 sps:$4 sm:$0xff]  }
 0x140   : > { %v3675_v53 = vpop.permute.xlu0 %1170 }
 0x142   : > { %1457 = vmatpush2.bf16.msra.mxu1 %v1050_v34  ;;  %v2750_v34 = vld [vmem:[%s4074_s3 + $0xe0] ss:$8 sps:$4 sm:$0xff]  }
 0x143   : > { %1458 = vmatprep.subr.bf16.mxu1 %v1049_v19  ;;  %v3673_v19 = vpop.permute.xlu1 %1185 }
 0x144   : > { %v3679_v23 = vpop.permute.xlu0 %1160 }
 0x146   : > { %1459 = vmatpush2.bf16.msra.mxu1 %v1048_v29 }
 0x147   : > { %1460 = vmatprep.subr.bf16.mxu1 %v1047_v58  ;;  %v3677_v44 = vpop.permute.xlu1 %1175 }
 0x148   : > { %v3683_v21 = vpop.permute.xlu0 %1150 }
 0x14a   : > { %1461 = vmatpush2.bf16.msra.mxu1 %v1046_v57 }
 0x14b   : > { %1462 = vmatprep.subr.bf16.mxu1 %v1045_v15  ;;  %v3681_v7 = vpop.permute.xlu1 %1165 }
 0x14c   : > { %v3687_v26 = vpop.permute.xlu0 %1140 }
 0x14e   : > { %1463 = vmatpush2.bf16.msra.mxu1 %v1044_v32 }
 0x14f   : > { %1464 = vmatprep.subr.bf16.mxu1 %v1043_v47  ;;  %v3685_v25 = vpop.permute.xlu1 %1155 }
 0x150   : > { %v1131_v54 = vpop.permute.xlu0 %1130 }
 0x152   : > { %1465 = vmatpush2.bf16.msra.mxu1 %v4131_v51 }
 0x153   : > { %1466 = vmatprep.subr.bf16.mxu1 %v4132_v16  ;;  %v3689_v37 = vpop.permute.xlu1 %1145 }
 0x154   : > { %v1121_v28 = vpop.permute.xlu0 %1120 }
 0x156   : > { %1467 = vmatpush2.bf16.msra.mxu1 %v4133_v11 }
 0x157   : > { %1468 = vmatprep.subr.bf16.mxu1 %v4134_v31  ;;  %v1136_v29 = vpop.permute.xlu1 %1135 }
 0x15a   : > { %1469 = vmatpush2.bf16.msra.mxu1 %v4135_v55 }
 0x15b   : > { %v1126_v30 = vpop.permute.xlu1 %1125 }
 0x15d   : > { %1471 = vmatmul.mubr.bf16.vlgmr.msra.gmra.mxu1 %v2706_v38 }
 0x15e   : > { %1480 = vmatprep.mubr.bf16.mxu1 %v2709_v8 }
 0x165   : > { %1481 = vmatmul.mubr.bf16.gmra.mxu1 %v2711_v62 }
 0x166   : > { %1490 = vmatprep.mubr.bf16.mxu1 %v2712_v61 }
 0x16d   : > { %1491 = vmatmul.mubr.bf16.gmra.mxu1 %v2714_v36 }
 0x16e   : > { %1500 = vmatprep.mubr.bf16.mxu1 %v2715_v9 }
 0x175   : > { %1501 = vmatmul.mubr.bf16.gmra.mxu1 %v2717_v12 }
 0x176   : > { %1510 = vmatprep.mubr.bf16.mxu1 %v2718_v45 }
 0x17d   : > { %1511 = vmatmul.mubr.bf16.gmra.mxu1 %v2720_v6 }
 0x17e   : > { %1520 = vmatprep.mubr.bf16.mxu1 %v2721_v14 }
 0x185   : > { %1521 = vmatmul.mubr.bf16.gmra.mxu1 %v2723_v4 }
 0x186   : > { %1530 = vmatprep.mubr.bf16.mxu1 %v2724_v33 }
 0x18d   : > { %1531 = vmatmul.mubr.bf16.gmra.mxu1 %v2726_v27 }
 0x18e   : > { %1540 = vmatprep.mubr.bf16.mxu1 %v2727_v39 }
 0x195   : > { %1541 = vmatmul.mubr.bf16.gmra.mxu1 %v2729_v43 }
 0x196   : > { %1550 = vmatprep.mubr.bf16.mxu1 %v2730_v63  ;;  %v3707_v63 = vpop.permute.xlu0 %1270 }
 0x19d   : > { %1551 = vmatmul.mubr.bf16.gmra.mxu1 %v2732_v24 }
 0x19e   : > { %1560 = vmatprep.mubr.bf16.mxu1 %v2733_v46  ;;  %v3711_v46 = vpop.permute.xlu1 %1275 }
 0x1a5   : > { %1561 = vmatmul.mubr.bf16.gmra.mxu1 %v2735_v59 }
 0x1a6   : > { %1570 = vmatprep.mubr.bf16.mxu1 %v2736_v1 }
 0x1ad   : > { %1571 = vmatmul.mubr.bf16.gmra.mxu1 %v2738_v56  ;;  %v3717_v56 = vpop.permute.xlu0 %1260 }
 0x1ae   : > { %1580 = vmatprep.mubr.bf16.mxu1 %v2739_v2 }
 0x1b5   : > { %1581 = vmatmul.mubr.bf16.gmra.mxu1 %v2741_v49  ;;  %v3719_v49 = vpop.permute.xlu1 %1265 }
 0x1b6   : > { %1590 = vmatprep.mubr.bf16.mxu1 %v2742_v17 }
 0x1bd   : > { %1591 = vmatmul.mubr.bf16.gmra.mxu1 %v2744_v60 }
 0x1be   : > { %1600 = vmatprep.mubr.bf16.mxu1 %v2745_v20  ;;  %v2756_v20 = vld [vmem:[%s4076_s5 + $0x4] ss:$8 sps:$4 sm:$0xff]  }
 0x1bf   : > { %2143 = vmatprep.mubr.bf16.mxu0 %v2756_v20 }
 0x1c5   : > { %1601 = vmatmul.mubr.bf16.gmra.mxu1 %v2747_v3  ;;  %v3726_v3 = vpop.permute.xlu0 %1250 }
 0x1c6   : > { %1610 = vmatprep.mubr.bf16.mxu1 %v2748_v48 }
 0x1cd   : > { %1611 = vmatmul.mubr.bf16.gmra.mxu1 %v2750_v34  ;;  %v3730_v34 = vpop.permute.xlu1 %1255 }
 0x1ce   : > { %1620 = vmatprep.mubr.bf16.mxu1 %v2751_v10 }
 0x1d5   : > { %1621 = vmatmul.mubr.bf16.gmra.mxu1 %v2753_v50 }
 0x21d   : > { %v1472_v0 = vpop.f32.mrf.mxu1 }
 0x21e   : > { %v1473_v41 = vadd.f32 %v1472_v0, %v1121_v28  ;;  %v3734_v0 = vpop.permute.xlu1 %1245 }
 0x21f   : > { %v1474_v13 = vpop.f32.mrf.mxu1  ;;  %4137 = vst [vmem:[#allocation23_spill] sm:$0xff] %v3734_v0 }
 0x220   : > { %v1475_v35 = vadd.f32 %v1474_v13, %v1121_v28  ;;  %v1631_v5 = vmax.f32 %v1473_v41, 0.0 }
 0x221   : > { %v1476_v58 = vpop.f32.mrf.mxu1 }
 0x222   : > { %v1477_v42 = vadd.f32 %v1476_v58, %v1126_v30  ;;  %v1632_v47 = vmax.f32 %v1475_v35, 0.0  ;;  %v3738_v58 = vpop.permute.xlu1 %1235 }
 0x223   : > { %v1478_v57 = vpop.f32.mrf.mxu1  ;;  %4139 = vst [vmem:[#allocation3_spill] sm:$0xff] %v3738_v58 }
 0x224   : > { %v1633_v22 = vmax.f32 %v1477_v42, 0.0  ;;  %v1479_v15 = vadd.f32 %v1478_v57, %v1126_v30 }
 0x225   : > { %v1482_v32 = vpop.f32.mrf.mxu1 }
 0x226   : > { %v3691_v51 = vpack.c.bf16 %v1633_v22, %v1631_v5  ;;  %v1634_v16 = vmax.f32 %v1479_v15, 0.0  ;;  %v1483_v38 = vadd.f32 %v1482_v32, %v1131_v54  ;;  %v3742_v22 = vpop.permute.xlu1 %1225 }
 0x227   : > { %v1484_v11 = vpop.f32.mrf.mxu1  ;;  %4141 = vst [vmem:[#allocation4_spill] sm:$0xff] %v3742_v22 }
 0x228   : > { %v3693_v31 = vpack.c.bf16 %v1634_v16, %v1632_v47  ;;  %v1485_v8 = vadd.f32 %v1484_v11, %v1131_v54  ;;  %v1635_v36 = vmax.f32 %v1483_v38, 0.0  ;;  %v3732_v54 = vpop.permute.xlu0 %1240 }
 0x229   : > { %v1486_v55 = vpop.f32.mrf.mxu1  ;;  %4136 = vst [vmem:[#allocation20_spill] sm:$0xff] %v3732_v54 }
 0x22a   : > { %v1487_v62 = vadd.f32 %v1486_v55, %v1136_v29  ;;  %v1636_v6 = vmax.f32 %v1485_v8, 0.0  ;;  %v3749_v8 = vpop.permute.xlu1 %1215 }
 0x22b   : > { %v1488_v61 = vpop.f32.mrf.mxu1 }
 0x22c   : > { %v1637_v9 = vmax.f32 %v1487_v62, 0.0  ;;  %v1489_v12 = vadd.f32 %v1488_v61, %v1136_v29  ;;  %v3736_v41 = vpop.permute.xlu0 %1230 }
 0x22d   : > { %v3695_v45 = vpop.f32.mrf.mxu1  ;;  %4138 = vst [vmem:[#allocation24_spill] sm:$0xff] %v3736_v41 }
 0x22e   : > { %v3697_v14 = vpack.c.bf16 %v1637_v9, %v1635_v36  ;;  %v1638_v4 = vmax.f32 %v1489_v12, 0.0 }
 0x22f   : > { %v3699_v33 = vpop.f32.mrf.mxu1 }
 0x230   : > { %v3701_v27 = vpack.c.bf16 %v1638_v4, %v1636_v6  ;;  %v3740_v57 = vpop.permute.xlu0 %1220 }
 0x231   : > { %v3703_v39 = vpop.f32.mrf.mxu1  ;;  %4140 = vst [vmem:[#allocation22_spill] sm:$0xff] %v3740_v57 }
 0x233   : > { %v3705_v43 = vpop.f32.mrf.mxu1 }
 0x234   : > { %v3744_v47 = vpop.permute.xlu0 %1210 }
 0x235   : > { %v3709_v24 = vpop.f32.mrf.mxu1 }
 0x237   : > { %v3713_v59 = vpop.f32.mrf.mxu1 }
 0x238   : > { %v1201_v22 = vpop.permute.xlu0 %1200 }
 0x239   : > { %v3715_v1 = vpop.f32.mrf.mxu1 }
 0x23b   : > { %v1508_v2 = vpop.f32.mrf.mxu1 }
 0x23d   : > { %v3721_v17 = vpop.f32.mrf.mxu1 }
 0x23f   : > { %v1514_v60 = vpop.f32.mrf.mxu1 }
 0x241   : > { %v3728_v48 = vpop.f32.mrf.mxu1 }
 0x243   : > { %v1518_v10 = vpop.f32.mrf.mxu1 }
 0x245   : > { %v1522_v50 = vpop.f32.mrf.mxu1 }
 0x247   : > { %v1524_v29 = vpop.f32.mrf.mxu1 }
 0x249   : > { %v1526_v28 = vpop.f32.mrf.mxu1 }
 0x24b   : > { %v1528_v13 = vpop.f32.mrf.mxu1 }
 0x24c   : > { %v1529_v20 = vadd.f32 %v1528_v13, %v3677_v44 }
 0x24d   : > { %v1532_v30 = vpop.f32.mrf.mxu1 }
 0x24f   : > { %v1534_v35 = vpop.f32.mrf.mxu1 }
 0x250   : > { %v1535_v36 = vadd.f32 %v1534_v35, %v3671_v40 }
 0x251   : > { %v1536_v42 = vpop.f32.mrf.mxu1 }
 0x252   : > { %v1537_v12 = vadd.f32 %v1536_v42, %v3673_v19  ;;  %v1527_v42 = vadd.f32 %v1526_v28, %v3677_v44 }
 0x253   : > { %v1538_v5 = vpop.f32.mrf.mxu1 }
 0x254   : > { %v1539_v11 = vadd.f32 %v1538_v5, %v3673_v19  ;;  %v1519_v19 = vadd.f32 %v1518_v10, %v3681_v7 }
 0x255   : > { %v1542_v15 = vpop.f32.mrf.mxu1 }
 0x256   : > { %v1543_v62 = vadd.f32 %v1542_v15, %v3667_v52  ;;  %v1658_v5 = vmax.f32 %v1539_v11, 0.0  ;;  %v1656_v15 = vmax.f32 %v1535_v36, 0.0 }
 0x257   : > { %v1544_v32 = vpop.f32.mrf.mxu1 }
 0x258   : > { %v1545_v38 = vadd.f32 %v1544_v32, %v3667_v52  ;;  %v1659_v41 = vmax.f32 %v1543_v62, 0.0  ;;  %v1525_v52 = vadd.f32 %v1524_v29, %v3675_v53  ;;  %v1515_v29 = vadd.f32 %v1514_v60, %v3679_v23 }
 0x259   : > { %v1546_v16 = vpop.f32.mrf.mxu1 }
 0x25a   : > { %v1547_v55 = vadd.f32 %v1546_v16, %v3669_v18  ;;  %v1660_v57 = vmax.f32 %v1545_v38, 0.0  ;;  %v1533_v16 = vadd.f32 %v1532_v30, %v3671_v40  ;;  %v1654_v38 = vmax.f32 %v1529_v20, 0.0 }
 0x25b   : > { %v1548_v61 = vpop.f32.mrf.mxu1  ;;  %v1509_v40 = vadd.f32 %v1508_v2, %v3685_v25  ;;  %v1523_v30 = vadd.f32 %v1522_v50, %v3675_v53  ;;  %v1652_v10 = vmax.f32 %v1525_v52, 0.0  ;;  %v1513_v50 = vadd.f32 %v3721_v17, %v3679_v23 }
 0x25c   : > { %v1549_v9 = vadd.f32 %v1548_v61, %v3669_v18  ;;  %v1661_v6 = vmax.f32 %v1547_v55, 0.0  ;;  %v1206_v18 = vpop.permute.xlu1 %1205  ;;  %v1657_v55 = vmax.f32 %v1537_v12, 0.0  ;;  %v1708_v61 = vpack.c.bf16 %v1658_v5, %v1656_v15 }
 0x25d   : > { %v1552_v4 = vpop.f32.mrf.mxu1  ;;  %v1706_v2 = vpack.c.bf16 %v1654_v38, %v1652_v10  ;;  %v1651_v20 = vmax.f32 %v1523_v30, 0.0  ;;  %v1648_v5 = vmax.f32 %v1515_v29, 0.0  ;;  %v1646_v15 = vmax.f32 %v1509_v40, 0.0 }
 0x25e   : > { %v1662_v32 = vmax.f32 %v1549_v9, 0.0  ;;  %v1553_v54 = vadd.f32 %v1552_v4, %v1201_v22  ;;  %v1709_v13 = vpack.c.bf16 %v1661_v6, %v1659_v41  ;;  %v1517_v41 = vadd.f32 %v3728_v48, %v3681_v7 }
 0x25f   : > { %v1554_v58 = vpop.f32.mrf.mxu1  ;;  %v1493_v30 = vadd.f32 %v3695_v45, %v3687_v26 }
 0x260   : > { %v1710_v35 = vpack.c.bf16 %v1662_v32, %v1660_v57  ;;  %v1555_v9 = vadd.f32 %v1554_v58, %v1201_v22  ;;  %v1655_v57 = vmax.f32 %v1533_v16, 0.0  ;;  %v1663_v36 = vmax.f32 %v1553_v54, 0.0 }
 0x261   : > { %v1556_v11 = vpop.f32.mrf.mxu1  ;;  %v1650_v58 = vmax.f32 %v1519_v19, 0.0  ;;  %v1653_v22 = vmax.f32 %v1527_v42, 0.0  ;;  %v1499_v32 = vadd.f32 %v3705_v43, %v3689_v37  ;;  %v1507_v16 = vadd.f32 %v3715_v1, %v3685_v25 }
 0x262   : > { %v1557_v0 = vadd.f32 %v1556_v11, %v1206_v18  ;;  %2111 = vmatprep.subr.bf16.mxu0 %v1710_v35  ;;  %v1707_v12 = vpack.c.bf16 %v1657_v55, %v1655_v57  ;;  %v1664_v4 = vmax.f32 %v1555_v9, 0.0  ;;  %v1649_v52 = vmax.f32 %v1517_v41, 0.0 }
 0x263   : > { %v1558_v62 = vpop.f32.mrf.mxu1  ;;  %2112 = vmatpush1.bf16.msra.mxu0 %v1709_v13  ;;  %v1705_v23 = vpack.c.bf16 %v1653_v22, %v1651_v20  ;;  %v1704_v35 = vpack.c.bf16 %v1650_v58, %v1648_v5  ;;  %v1495_v19 = vadd.f32 %v3699_v33, %v3687_v26  ;;  %v1503_v42 = vadd.f32 %v3709_v24, %v3683_v21 }
 0x264   : > { %v1665_v44 = vmax.f32 %v1557_v0, 0.0  ;;  %v1559_v28 = vadd.f32 %v1558_v62, %v1206_v18  ;;  %2113 = vmatprep.subr.bf16.mxu0 %v1708_v61  ;;  %v1505_v0 = vadd.f32 %v3713_v59, %v3683_v21  ;;  %v1647_v55 = vmax.f32 %v1513_v50, 0.0 }
 0x265   : > { %v1562_v6 = vpop.f32.mrf.mxu1  ;;  %v1642_v38 = vmax.f32 %v1499_v32, 0.0  ;;  %v1645_v61 = vmax.f32 %v1507_v16, 0.0  ;;  %v1643_v57 = vmax.f32 %v1503_v42, 0.0 }
 0x266   : > { %v3765_v60 = vpack.c.bf16 %v1665_v44, %v1663_v36  ;;  %v1666_v53 = vmax.f32 %v1559_v28, 0.0  ;;  %v1563_v48 = vadd.f32 %v1562_v6, %v3744_v47  ;;  %v1644_v13 = vmax.f32 %v1505_v0, 0.0 }
 0x267   : > { %v1564_v54 = vpop.f32.mrf.mxu1  ;;  %2114 = vmatpush1.bf16.msra.mxu0 %v1707_v12  ;;  %v1703_v9 = vpack.c.bf16 %v1649_v52, %v1647_v55  ;;  %v1639_v28 = vmax.f32 %v1493_v30, 0.0 }
 0x268   : > { %v3771_v7 = vpack.c.bf16 %v1666_v53, %v1664_v4  ;;  %2115 = vmatprep.subr.bf16.mxu0 %v1706_v2  ;;  %v1565_v18 = vadd.f32 %v1564_v54, %v3744_v47  ;;  %v1667_v25 = vmax.f32 %v1563_v48, 0.0  ;;  %v1497_v47 = vadd.f32 %v3703_v39, %v3689_v37 }
 0x269   : > { %v1566_v17 = vpop.f32.mrf.mxu1  ;;  %v1702_v33 = vpack.c.bf16 %v1646_v15, %v1644_v13  ;;  %v1701_v39 = vpack.c.bf16 %v1645_v61, %v1643_v57  ;;  %v4143_v57 = vld [vmem:[#allocation20_spill] sm:$0xff] }
 0x26a   : > { %v1567_v59 = vadd.f32 %v1566_v17, %v3749_v8  ;;  %v1668_v29 = vmax.f32 %v1565_v18, 0.0  ;;  %v1641_v37 = vmax.f32 %v1497_v47, 0.0 }
 0x26b   : > { %v1568_v43 = vpop.f32.mrf.mxu1  ;;  %2116 = vmatpush1.bf16.msra.mxu0 %v1705_v23 }
 0x26c   : > { %v1669_v1 = vmax.f32 %v1567_v59, 0.0  ;;  %v1569_v11 = vadd.f32 %v1568_v43, %v3749_v8  ;;  %2117 = vmatprep.subr.bf16.mxu0 %v1704_v35  ;;  %v1640_v8 = vmax.f32 %v1495_v19, 0.0  ;;  %v1699_v58 = vpack.c.bf16 %v1641_v37, %v1639_v28 }
 0x26d   : > { %v3787_v40 = vpop.f32.mrf.mxu1 }
 0x26e   : > { %v3789_v21 = vpack.c.bf16 %v1669_v1, %v1667_v25  ;;  %v1670_v24 = vmax.f32 %v1569_v11, 0.0  ;;  %v1700_v44 = vpack.c.bf16 %v1642_v38, %v1640_v8 }
 0x26f   : > { %v3793_v62 = vpop.f32.mrf.mxu1  ;;  %2118 = vmatpush1.bf16.msra.mxu0 %v1703_v9 }
 0x270   : > { %v3795_v10 = vpack.c.bf16 %v1670_v24, %v1668_v29  ;;  %2119 = vmatprep.subr.bf16.mxu0 %v1702_v33 }
 0x271   : > { %v3797_v36 = vpop.f32.mrf.mxu1 }
 0x273   : > { %v3799_v41 = vpop.f32.mrf.mxu1  ;;  %2120 = vmatpush1.bf16.msra.mxu0 %v1701_v39 }
 0x274   : > { %2121 = vmatprep.subr.bf16.mxu0 %v1700_v44 }
 0x275   : > { %v3801_v26 = vpop.f32.mrf.mxu1 }
 0x277   : > { %v3803_v45 = vpop.f32.mrf.mxu1  ;;  %2122 = vmatpush1.bf16.msra.mxu0 %v1699_v58 }
 0x278   : > { %2123 = vmatprep.subr.bf16.mxu0 %v3701_v27 }
 0x279   : > { %v3806_v22 = vpop.f32.mrf.mxu1 }
 0x27b   : > { %v1588_v12 = vpop.f32.mrf.mxu1  ;;  %2124 = vmatpush1.bf16.msra.mxu0 %v3697_v14 }
 0x27c   : > { %2125 = vmatprep.subr.bf16.mxu0 %v3693_v31 }
 0x27d   : > { %v1592_v6 = vpop.f32.mrf.mxu1 }
 0x27f   : > { %v1594_v2 = vpop.f32.mrf.mxu1  ;;  %2126 = vmatpush1.bf16.msra.mxu0 %v3691_v51 }
 0x281   : > { %v1596_v4 = vpop.f32.mrf.mxu1 }
 0x283   : > { %v1598_v53 = vpop.f32.mrf.mxu1 }
 0x285   : > { %v1602_v50 = vpop.f32.mrf.mxu1 }
 0x286   : > { %v1603_v24 = vadd.f32 %v1602_v50, %v3726_v3 }
 0x287   : > { %v1604_v20 = vpop.f32.mrf.mxu1 }
 0x288   : > { %v1605_v11 = vadd.f32 %v1604_v20, %v3726_v3 }
 0x289   : > { %v1606_v54 = vpop.f32.mrf.mxu1 }
 0x28a   : > { %v1607_v38 = vadd.f32 %v1606_v54, %v3730_v34  ;;  %v1684_v8 = vmax.f32 %v1605_v11, 0.0  ;;  %v1683_v54 = vmax.f32 %v1603_v24, 0.0  ;;  %v2774_v11 = vld [vmem:[%s4076_s5 + $0x60] ss:$8 sps:$4 sm:$0xff]   ;;  %v2789_v24 = vld [vmem:[%s4076_s5 + $0xb0] ss:$8 sps:$4 sm:$0xff]  }
 0x28b   : > { %v1608_v0 = vpop.f32.mrf.mxu1 }
 0x28c   : > { %v1609_v42 = vadd.f32 %v1608_v0, %v3730_v34  ;;  %v1685_v39 = vmax.f32 %v1607_v38, 0.0  ;;  %v4144_v34 = vld [vmem:[#allocation3_spill] sm:$0xff]  ;;  %v4145_v0 = vld [vmem:[#allocation24_spill] sm:$0xff] }
 0x28d   : > { %v1612_v5 = vpop.f32.mrf.mxu1  ;;  %v1589_v28 = vadd.f32 %v1588_v12, %v4144_v34  ;;  %v1585_v3 = vadd.f32 %v3803_v45, %v4145_v0  ;;  %v2778_v38 = vld [vmem:[%s4076_s5 + $0x84] ss:$8 sps:$4 sm:$0xff]  }
 0x28e   : > { %v1613_v25 = vadd.f32 %v1612_v5, %v3717_v56 }
 0x28f   : > { %v1614_v48 = vpop.f32.mrf.mxu1  ;;  %v1678_v12 = vmax.f32 %v1589_v28, 0.0 }
 0x290   : > { %v1615_v35 = vadd.f32 %v1614_v48, %v3717_v56  ;;  %v1687_v30 = vmax.f32 %v1613_v25, 0.0  ;;  %v1595_v56 = vadd.f32 %v1594_v2, %v4143_v57  ;;  %v1587_v2 = vadd.f32 %v3806_v22, %v4144_v34  ;;  %v4146_v48 = vld [vmem:[#allocation4_spill] sm:$0xff] }
 0x291   : > { %v1616_v27 = vpop.f32.mrf.mxu1  ;;  %v1577_v22 = vadd.f32 %v3797_v36, %v4146_v48  ;;  %v2757_v36 = vld [vmem:[%s4076_s5 + $0x14] ss:$8 sps:$4 sm:$0xff]   ;;  %v2771_v25 = vld [vmem:[%s4076_s5 + $0x50] ss:$8 sps:$4 sm:$0xff]  }
 0x292   : > { %v1617_v59 = vadd.f32 %v1616_v27, %v3719_v49  ;;  %v1688_v47 = vmax.f32 %v1615_v35, 0.0  ;;  %v1680_v50 = vmax.f32 %v1595_v56, 0.0  ;;  %v1579_v27 = vadd.f32 %v3799_v41, %v4146_v48  ;;  %v2793_v56 = vld [vmem:[%s4076_s5 + $0xd4] ss:$8 sps:$4 sm:$0xff]   ;;  %v2801_v34 = vld [vmem:[%s4076_s5 + $0xf0] ss:$8 sps:$4 sm:$0xff]  }
 0x293   : > { %v1618_v32 = vpop.f32.mrf.mxu1  ;;  %v1673_v35 = vmax.f32 %v1577_v22, 0.0 }
 0x294   : > { %v1619_v14 = vadd.f32 %v1618_v32, %v3719_v49  ;;  %v1689_v61 = vmax.f32 %v1617_v59, 0.0  ;;  %v1686_v49 = vmax.f32 %v1609_v42, 0.0  ;;  %v2765_v42 = vld [vmem:[%s4076_s5 + $0x30] ss:$8 sps:$4 sm:$0xff]  }
 0x295   : > { %v1622_v16 = vpop.f32.mrf.mxu1 }
 0x296   : > { %v1623_v51 = vadd.f32 %v1622_v16, %v3707_v63  ;;  %v1690_v55 = vmax.f32 %v1619_v14, 0.0  ;;  %v1723_v44 = vpack.c.bf16 %v1689_v61, %v1687_v30  ;;  %v1722_v20 = vpack.c.bf16 %v1686_v49, %v1684_v8  ;;  %v2780_v61 = vld [vmem:[%s4076_s5 + $0x80] ss:$8 sps:$4 sm:$0xff]   ;;  %v2790_v30 = vld [vmem:[%s4076_s5 + $0xc4] ss:$8 sps:$4 sm:$0xff]  }
 0x297   : > { %v1624_v52 = vpop.f32.mrf.mxu1  ;;  %v1677_v14 = vmax.f32 %v1587_v2, 0.0  ;;  %v2786_v49 = vld [vmem:[%s4076_s5 + $0xa0] ss:$8 sps:$4 sm:$0xff]   ;;  %v2795_v8 = vld [vmem:[%s4076_s5 + $0xd0] ss:$8 sps:$4 sm:$0xff]  }
 0x298   : > { %v1625_v31 = vadd.f32 %v1624_v52, %v3707_v63  ;;  %v1691_v1 = vmax.f32 %v1623_v51, 0.0  ;;  %v1724_v29 = vpack.c.bf16 %v1690_v55, %v1688_v47  ;;  %v4147_v52 = vld [vmem:[#allocation22_spill] sm:$0xff]  ;;  %v2766_v55 = vld [vmem:[%s4076_s5 + $0x44] ss:$8 sps:$4 sm:$0xff]  }
 0x299   : > { %v1626_v23 = vpop.f32.mrf.mxu1  ;;  %v1575_v45 = vadd.f32 %v3793_v62, %v4147_v52  ;;  %v1573_v41 = vadd.f32 %v3787_v40, %v4147_v52  ;;  %v2754_v40 = vld [vmem:[%s4076_s5] ss:$8 sps:$4 sm:$0xff]   ;;  %v2775_v47 = vld [vmem:[%s4076_s5 + $0x74] ss:$8 sps:$4 sm:$0xff]  }
 0x29a   : > { %v1627_v17 = vadd.f32 %v1626_v23, %v3711_v46  ;;  %v1692_v43 = vmax.f32 %v1625_v31, 0.0  ;;  %v1676_v23 = vmax.f32 %v1585_v3, 0.0  ;;  %v3975_v52 = vld [vmem:[%s4078_s7] sm:$0x3] }
 0x29b   : > { %v1628_v15 = vpop.f32.mrf.mxu1  ;;  %v1671_v62 = vmax.f32 %v1573_v41, 0.0 }
 0x29c   : > { %v1629_v18 = vadd.f32 %v1628_v15, %v3711_v46  ;;  %v1693_v19 = vmax.f32 %v1627_v17, 0.0  ;;  %v4142_v46 = vld [vmem:[#allocation23_spill] sm:$0xff]  ;;  %v1674_v17 = vmax.f32 %v1579_v27, 0.0  ;;  %v1718_v51 = vpack.c.bf16 %v1678_v12, %v1676_v23 }
 0x29d   : > { %v1599_v33 = vadd.f32 %v1598_v53, %v4142_v46  ;;  %v1597_v37 = vadd.f32 %v1596_v4, %v4142_v46  ;;  %v1593_v53 = vadd.f32 %v1592_v6, %v4143_v57  ;;  %v1721_v4 = vpack.c.bf16 %v1685_v39, %v1683_v54  ;;  %v2783_v46 = vld [vmem:[%s4076_s5 + $0x90] ss:$8 sps:$4 sm:$0xff]   ;;  %v2792_v57 = vld [vmem:[%s4076_s5 + $0xc0] ss:$8 sps:$4 sm:$0xff]  }
 0x29e   : > { %v1694_v13 = vmax.f32 %v1629_v18, 0.0  ;;  %v1725_v9 = vpack.c.bf16 %v1693_v19, %v1691_v1  ;;  %v1583_v6 = vadd.f32 %v3801_v26, %v4145_v0  ;;  %v1672_v26 = vmax.f32 %v1575_v45, 0.0  ;;  %v2772_v1 = vld [vmem:[%s4076_s5 + $0x64] ss:$8 sps:$4 sm:$0xff]   ;;  %v2798_v39 = vld [vmem:[%s4076_s5 + $0xe0] ss:$8 sps:$4 sm:$0xff]  }
 0x29f   : > { %v1682_v58 = vmax.f32 %v1599_v33, 0.0  ;;  %v1681_v5 = vmax.f32 %v1597_v37, 0.0  ;;  %v1679_v16 = vmax.f32 %v1593_v53, 0.0  ;;  %v1715_v19 = vpack.c.bf16 %v1673_v35, %v1671_v62  ;;  %v2784_v33 = vld [vmem:[%s4076_s5 + $0xa4] ss:$8 sps:$4 sm:$0xff]   ;;  %v1869_v35 = vpop.permute.xlu0 %1868 }
 0x2a0   : > { %v1726_v63 = vpack.c.bf16 %v1694_v13, %v1692_v43  ;;  %v1675_v15 = vmax.f32 %v1583_v6, 0.0  ;;  %v1716_v59 = vpack.c.bf16 %v1674_v17, %v1672_v26  ;;  %v2768_v43 = vld [vmem:[%s4076_s5 + $0x40] ss:$8 sps:$4 sm:$0xff]   ;;  %v2769_v13 = vld [vmem:[%s4076_s5 + $0x54] ss:$8 sps:$4 sm:$0xff]   ;;  %v2375_v12 = vlaneseq }
 0x2a1   : > { %v1720_v32 = vpack.c.bf16 %v1682_v58, %v1680_v50  ;;  %v1719_v31 = vpack.c.bf16 %v1681_v5, %v1679_v16  ;;  %v2796_v37 = vld [vmem:[%s4076_s5 + $0xe4] ss:$8 sps:$4 sm:$0xff]  }
 0x2a2   : > { %2127 = vmatprep.subr.bf16.mxu0 %v1726_v63  ;;  %v1717_v18 = vpack.c.bf16 %v1677_v14, %v1675_v15  ;;  %v2777_v63 = vld [vmem:[%s4076_s5 + $0x70] ss:$8 sps:$4 sm:$0xff]   ;;  %v3970_v16 = vshrl.u32 %v2375_v12, 7  ;;  %vm2481_vm2 = vcmp.lt.s32.totalorder %v2375_v12, 256 }
 0x2a3   : > { %2128 = vmatpush2.bf16.msra.mxu0 %v1725_v9  ;;  %v2781_v9 = vld [vmem:[%s4076_s5 + $0x94] ss:$8 sps:$4 sm:$0xff]  }
 0x2a4   : > { %2129 = vmatprep.subr.bf16.mxu0 %v1724_v29  ;;  %v2787_v29 = vld [vmem:[%s4076_s5 + $0xb4] ss:$8 sps:$4 sm:$0xff]   ;;  %v2386_v23 = vsub.s32 1, %v3970_v16 }
 0x2a6   : > { %v2387_v14 = vrot.slane %v3975_v52, %v2386_v23 }
 0x2a7   : > { %2130 = vmatpush2.bf16.msra.mxu0 %v1723_v44  ;;  %v2799_v44 = vld [vmem:[%s4076_s5 + $0xf4] ss:$8 sps:$4 sm:$0xff]  }
 0x2a8   : > { %2131 = vmatprep.subr.bf16.mxu0 %v1722_v20  ;;  %2454 = vmatprep.mubr.f32.mxu1 %v2387_v14 }
 0x2ab   : > { %2132 = vmatpush2.bf16.msra.mxu0 %v1721_v4 }
 0x2ac   : > { %2133 = vmatprep.subr.bf16.mxu0 %v1720_v32 }
 0x2af   : > { %2134 = vmatpush2.bf16.msra.mxu0 %v1719_v31 }
 0x2b0   : > { %2135 = vmatprep.subr.bf16.mxu0 %v1718_v51 }
 0x2b3   : > { %2136 = vmatpush2.bf16.msra.mxu0 %v1717_v18 }
 0x2b4   : > { %2137 = vmatprep.subr.bf16.mxu0 %v1716_v59  ;;  %v1864_v59 = vpop.permute.xlu1 %1863 }
 0x2b7   : > { %2138 = vmatpush2.bf16.msra.mxu0 %v1715_v19 }
 0x2b8   : > { %2139 = vmatprep.subr.bf16.mxu0 %v3795_v10  ;;  %v2759_v10 = vld [vmem:[%s4076_s5 + $0x10] ss:$8 sps:$4 sm:$0xff]  }
 0x2bb   : > { %2140 = vmatpush2.bf16.msra.mxu0 %v3789_v21  ;;  %v2763_v21 = vld [vmem:[%s4076_s5 + $0x34] ss:$8 sps:$4 sm:$0xff]  }
 0x2bc   : > { %2141 = vmatprep.subr.bf16.mxu0 %v3771_v7  ;;  %v2760_v7 = vld [vmem:[%s4076_s5 + $0x24] ss:$8 sps:$4 sm:$0xff]  }
 0x2bf   : > { %2142 = vmatpush2.bf16.msra.mxu0 %v3765_v60  ;;  %v2762_v60 = vld [vmem:[%s4076_s5 + $0x20] ss:$8 sps:$4 sm:$0xff]  }
 0x2c2   : > { %2144 = vmatmul.mubr.bf16.vlgmr.msra.gmra.mxu0 %v2754_v40  ;;  %v1859_v40 = vpop.permute.xlu0 %1858 }
 0x2c3   : > { %2153 = vmatprep.mubr.bf16.mxu0 %v2757_v36 }
 0x2ca   : > { %2154 = vmatmul.mubr.bf16.gmra.mxu0 %v2759_v10  ;;  %v1854_v10 = vpop.permute.xlu1 %1853 }
 0x2cb   : > { %2163 = vmatprep.mubr.bf16.mxu0 %v2760_v7 }
 0x2d2   : > { %2164 = vmatmul.mubr.bf16.gmra.mxu0 %v2762_v60 }
 0x2d3   : > { %2173 = vmatprep.mubr.bf16.mxu0 %v2763_v21  ;;  %v1849_v21 = vpop.permute.xlu0 %1848 }
 0x2da   : > { %2174 = vmatmul.mubr.bf16.gmra.mxu0 %v2765_v42 }
 0x2db   : > { %2183 = vmatprep.mubr.bf16.mxu0 %v2766_v55  ;;  %v1844_v55 = vpop.permute.xlu1 %1843 }
 0x2e2   : > { %2184 = vmatmul.mubr.bf16.gmra.mxu0 %v2768_v43 }
 0x2e3   : > { %2193 = vmatprep.mubr.bf16.mxu0 %v2769_v13 }
 0x2ea   : > { %2194 = vmatmul.mubr.bf16.gmra.mxu0 %v2771_v25 }
 0x2eb   : > { %2203 = vmatprep.mubr.bf16.mxu0 %v2772_v1 }
 0x2f2   : > { %2204 = vmatmul.mubr.bf16.gmra.mxu0 %v2774_v11 }
 0x2f3   : > { %2213 = vmatprep.mubr.bf16.mxu0 %v2775_v47  ;;  %v1839_v47 = vpop.permute.xlu0 %1838 }
 0x2fa   : > { %2214 = vmatmul.mubr.bf16.gmra.mxu0 %v2777_v63 }
 0x2fb   : > { %2223 = vmatprep.mubr.bf16.mxu0 %v2778_v38 }
 0x302   : > { %2224 = vmatmul.mubr.bf16.gmra.mxu0 %v2780_v61 }
 0x303   : > { %2233 = vmatprep.mubr.bf16.mxu0 %v2781_v9 }
 0x30a   : > { %2234 = vmatmul.mubr.bf16.gmra.mxu0 %v2783_v46  ;;  %v1834_v46 = vpop.permute.xlu1 %1833 }
 0x30b   : > { %2243 = vmatprep.mubr.bf16.mxu0 %v2784_v33 }
 0x312   : > { %2244 = vmatmul.mubr.bf16.gmra.mxu0 %v2786_v49 }
 0x313   : > { %2253 = vmatprep.mubr.bf16.mxu0 %v2787_v29 }
 0x31a   : > { %2254 = vmatmul.mubr.bf16.gmra.mxu0 %v2789_v24 }
 0x31b   : > { %2263 = vmatprep.mubr.bf16.mxu0 %v2790_v30 }
 0x322   : > { %2264 = vmatmul.mubr.bf16.gmra.mxu0 %v2792_v57 }
 0x323   : > { %2273 = vmatprep.mubr.bf16.mxu0 %v2793_v56 }
 0x32a   : > { %2274 = vmatmul.mubr.bf16.gmra.mxu0 %v2795_v8 }
 0x32b   : > { %2283 = vmatprep.mubr.bf16.mxu0 %v2796_v37 }
 0x332   : > { %2284 = vmatmul.mubr.bf16.gmra.mxu0 %v2798_v39 }
 0x333   : > { %2293 = vmatprep.mubr.bf16.mxu0 %v2799_v44  ;;  %v1829_v44 = vpop.permute.xlu0 %1828 }
 0x33a   : > { %2294 = vmatmul.mubr.bf16.gmra.mxu0 %v2801_v34 }
 0x382   : > { %v3939_v28 = vpop.f32.mrf.mxu0 }
 0x384   : > { %v3941_v58 = vpop.f32.mrf.mxu0 }
 0x386   : > { %v3943_v20 = vpop.f32.mrf.mxu0 }
 0x388   : > { %v3945_v53 = vpop.f32.mrf.mxu0 }
 0x38a   : > { %v3947_v54 = vpop.f32.mrf.mxu0 }
 0x38c   : > { %v3949_v0 = vpop.f32.mrf.mxu0 }
 0x38e   : > { %v3951_v3 = vpop.f32.mrf.mxu0 }
 0x390   : > { %v3953_v50 = vpop.f32.mrf.mxu0 }
 0x392   : > { %v3955_v2 = vpop.f32.mrf.mxu0 }
 0x394   : > { %v3957_v5 = vpop.f32.mrf.mxu0 }
 0x396   : > { %v3959_v4 = vpop.f32.mrf.mxu0 }
 0x398   : > { %v3961_v48 = vpop.f32.mrf.mxu0 }
 0x39a   : > { %v3963_v27 = vpop.f32.mrf.mxu0 }
 0x39c   : > { %v3965_v32 = vpop.f32.mrf.mxu0 }
 0x39e   : > { %v3967_v6 = vpop.f32.mrf.mxu0 }
 0x3a0   : > { %v3977_v45 = vpop.f32.mrf.mxu0 }
 0x3a2   : > { %v3980_v22 = vpop.f32.mrf.mxu0 }
 0x3a4   : > { %v3983_v31 = vpop.f32.mrf.mxu0 }
 0x3a6   : > { %v2189_v17 = vpop.f32.mrf.mxu0 }
 0x3a8   : > { %v2191_v51 = vpop.f32.mrf.mxu0 }
 0x3aa   : > { %v2195_v41 = vpop.f32.mrf.mxu0 }
 0x3ac   : > { %v2197_v15 = vpop.f32.mrf.mxu0 }
 0x3ae   : > { %v2199_v26 = vpop.f32.mrf.mxu0 }
 0x3af   : > { %v2200_v34 = vadd.f32 %v2199_v26, %v1849_v21  ;;  %v2188_v26 = vadd.f32 %v3983_v31, %v1834_v46 }
 0x3b0   : > { %v2201_v18 = vpop.f32.mrf.mxu0 }
 0x3b1   : > { %v2202_v37 = vadd.f32 %v2201_v18, %v1849_v21  ;;  %v2190_v18 = vadd.f32 %v2189_v17, %v1839_v47 }
 0x3b2   : > { %v2205_v62 = vpop.f32.mrf.mxu0 }
 0x3b3   : > { %v2206_v57 = vadd.f32 %v2205_v62, %v1854_v10 }
 0x3b4   : > { %v2207_v19 = vpop.f32.mrf.mxu0 }
 0x3b5   : > { %v2208_v24 = vadd.f32 %v2207_v19, %v1854_v10  ;;  %v1824_v19 = vpop.permute.xlu1 %1823  ;;  %v2192_v10 = vadd.f32 %v2191_v51, %v1839_v47  ;;  %v2182_v51 = vadd.f32 %v3977_v45, %v1829_v44  ;;  %v2321_v47 = vmax.f32 %v2188_v26, 0.0 }
 0x3b6   : > { %v2209_v36 = vpop.f32.mrf.mxu0  ;;  %v2178_v31 = vadd.f32 %v3965_v32, %v1824_v19 }
 0x3b7   : > { %v2210_v33 = vadd.f32 %v2209_v36, %v1859_v40  ;;  %v2328_v36 = vmax.f32 %v2206_v57, 0.0 }
 0x3b8   : > { %v2211_v7 = vpop.f32.mrf.mxu0 }
 0x3b9   : > { %v2212_v61 = vadd.f32 %v2211_v7, %v1859_v40  ;;  %v2330_v23 = vmax.f32 %v2210_v33, 0.0  ;;  %v2196_v40 = vadd.f32 %v2195_v41, %v1844_v55  ;;  %v2327_v7 = vmax.f32 %v2202_v37, 0.0  ;;  %v1814_v17 = vpop.permute.xlu1 %1813 }
 0x3ba   : > { %v2215_v60 = vpop.f32.mrf.mxu0  ;;  %v2168_v32 = vadd.f32 %v3957_v5, %v1814_v17 }
 0x3bb   : > { %v2216_v63 = vadd.f32 %v2215_v60, %v1864_v59  ;;  %v2331_v39 = vmax.f32 %v2212_v61, 0.0  ;;  %v2326_v60 = vmax.f32 %v2200_v34, 0.0  ;;  %v2324_v41 = vmax.f32 %v2196_v40, 0.0 }
 0x3bc   : > { %v2217_v42 = vpop.f32.mrf.mxu0  ;;  %v2313_v34 = vmax.f32 %v2168_v32, 0.0 }
 0x3bd   : > { %v2218_v1 = vadd.f32 %v2217_v42, %v1864_v59  ;;  %v2332_v56 = vmax.f32 %v2216_v63, 0.0  ;;  %v2329_v59 = vmax.f32 %v2208_v24, 0.0  ;;  %v2317_v24 = vmax.f32 %v2178_v31, 0.0 }
 0x3be   : > { %v2219_v43 = vpop.f32.mrf.mxu0 }
 0x3bf   : > { %v2220_v13 = vadd.f32 %v2219_v43, %v1869_v35  ;;  %v2333_v30 = vmax.f32 %v2218_v1, 0.0  ;;  %v2186_v43 = vadd.f32 %v3980_v22, %v1834_v46  ;;  %v2322_v1 = vmax.f32 %v2190_v18, 0.0 }
 0x3c0   : > { %v2221_v25 = vpop.f32.mrf.mxu0  ;;  %v2176_v22 = vadd.f32 %v3963_v27, %v1824_v19  ;;  %v1804_v27 = vpop.permute.xlu1 %1803 }
 0x3c1   : > { %v2222_v11 = vadd.f32 %v2221_v25, %v1869_v35  ;;  %v2334_v49 = vmax.f32 %v2220_v13, 0.0  ;;  %v2198_v35 = vadd.f32 %v2197_v15, %v1844_v55  ;;  %v1819_v15 = vpop.permute.xlu0 %1818  ;;  %v2323_v13 = vmax.f32 %v2192_v10, 0.0 }
 0x3c2   : > { %v3985_v38 = vpop.f32.mrf.mxu0  ;;  %v2180_v25 = vadd.f32 %v3967_v6, %v1829_v44  ;;  %v2320_v63 = vmax.f32 %v2186_v43, 0.0  ;;  %v2172_v45 = vadd.f32 %v3961_v48, %v1819_v15  ;;  %v2170_v6 = vadd.f32 %v3959_v4, %v1819_v15 }
 0x3c3   : > { %v2335_v9 = vmax.f32 %v2222_v11, 0.0  ;;  %v2325_v21 = vmax.f32 %v2198_v35, 0.0  ;;  %v2316_v57 = vmax.f32 %v2176_v22, 0.0  ;;  %v2158_v5 = vadd.f32 %v3949_v0, %v1804_v27 }
 0x3c4   : > { %v3987_v29 = vpop.f32.mrf.mxu0  ;;  %v2318_v33 = vmax.f32 %v2180_v25, 0.0  ;;  %v2315_v37 = vmax.f32 %v2172_v45, 0.0 }
 0x3c5   : > { %2390 = vmatprep.subr.mxu1 %v2335_v9  ;;  %v2319_v9 = vmax.f32 %v2182_v51, 0.0  ;;  %v1809_v46 = vpop.permute.xlu0 %1808 }
 0x3c6   : > { %v3989_v8 = vpop.f32.mrf.mxu0  ;;  %2391 = vmatpush1.msra.mxu1 %v2334_v49  ;;  %v2162_v48 = vadd.f32 %v3953_v50, %v1809_v46  ;;  %v2160_v4 = vadd.f32 %v3951_v3, %v1809_v46  ;;  %v1794_v3 = vpop.permute.xlu1 %1793 }
 0x3c7   : > { %2392 = vmatprep.subr.mxu1 %v2333_v30  ;;  %v2166_v30 = vadd.f32 %v3955_v2, %v1814_v17  ;;  %v2156_v2 = vadd.f32 %v3947_v54, %v1804_v27  ;;  %v2148_v0 = vadd.f32 %v3941_v58, %v1794_v3  ;;  %v2146_v54 = vadd.f32 %v3939_v28, %v1794_v3 }
 0x3c8   : > { %v3991_v14 = vpop.f32.mrf.mxu0  ;;  %2393 = vmatpush1.msra.mxu1 %v2332_v56  ;;  %v2311_v19 = vmax.f32 %v2162_v48, 0.0 }
 0x3c9   : > { %2394 = vmatprep.subr.mxu1 %v2331_v39  ;;  %v2314_v39 = vmax.f32 %v2170_v6, 0.0  ;;  %v2312_v35 = vmax.f32 %v2166_v30, 0.0  ;;  %v2308_v18 = vmax.f32 %v2156_v2, 0.0  ;;  %v2304_v15 = vmax.f32 %v2146_v54, 0.0 }
 0x3ca   : > { %v3993_v62 = vpop.f32.mrf.mxu0  ;;  %2395 = vmatpush1.msra.mxu1 %v2330_v23  ;;  %v1799_v23 = vpop.permute.xlu0 %1798 }
 0x3cb   : > { %2396 = vmatprep.subr.mxu1 %v2329_v59  ;;  %v2152_v50 = vadd.f32 %v3945_v53, %v1799_v23  ;;  %v2150_v40 = vadd.f32 %v3943_v20, %v1799_v23  ;;  %v2305_v20 = vmax.f32 %v2148_v0, 0.0  ;;  %v1944_v31 = vpop.permute.xlu1 %1943 }
 0x3cc   : > { %v3995_v42 = vpop.f32.mrf.mxu0  ;;  %2397 = vmatpush1.msra.mxu1 %v2328_v36  ;;  %v2310_v36 = vmax.f32 %v2160_v4, 0.0 }
 0x3cd   : > { %2398 = vmatprep.subr.mxu1 %v2327_v7  ;;  %v2309_v7 = vmax.f32 %v2158_v5, 0.0  ;;  %v2307_v53 = vmax.f32 %v2152_v50, 0.0  ;;  %v2306_v26 = vmax.f32 %v2150_v40, 0.0 }
 0x3ce   : > { %v3999_v55 = vpop.f32.mrf.mxu0  ;;  %2399 = vmatpush1.msra.mxu1 %v2326_v60  ;;  %v1949_v25 = vpop.permute.xlu0 %1948 }
 0x3cf   : > { %2400 = vmatprep.subr.mxu1 %v2325_v21 }
 0x3d0   : > { %v4003_v11 = vpop.f32.mrf.mxu0  ;;  %2401 = vmatpush1.msra.mxu1 %v2324_v41 }
 0x3d1   : > { %2402 = vmatprep.subr.mxu1 %v2323_v13 }
 0x3d2   : > { %v4007_v61 = vpop.f32.mrf.mxu0  ;;  %2403 = vmatpush1.msra.mxu1 %v2322_v1 }
 0x3d3   : > { %2404 = vmatprep.subr.mxu1 %v2321_v47 }
 0x3d4   : > { %v4011_v49 = vpop.f32.mrf.mxu0  ;;  %2405 = vmatpush1.msra.mxu1 %v2320_v63  ;;  %v1939_v63 = vpop.permute.xlu0 %1938 }
 0x3d5   : > { %2406 = vmatprep.subr.mxu1 %v2319_v9  ;;  %v1934_v9 = vpop.permute.xlu1 %1933 }
 0x3d6   : > { %v4015_v56 = vpop.f32.mrf.mxu0  ;;  %2407 = vmatpush1.msra.mxu1 %v2318_v33 }
 0x3d7   : > { %2408 = vmatprep.subr.mxu1 %v2317_v24 }
 0x3d8   : > { %v4019_v44 = vpop.f32.mrf.mxu0  ;;  %2409 = vmatpush1.msra.mxu1 %v2316_v57  ;;  %v1929_v33 = vpop.permute.xlu0 %1928 }
 0x3d9   : > { %2410 = vmatprep.subr.mxu1 %v2315_v37  ;;  %v1924_v24 = vpop.permute.xlu1 %1923 }
 0x3da   : > { %v4023_v59 = vpop.f32.mrf.mxu0  ;;  %2411 = vmatpush1.msra.mxu1 %v2314_v39 }
 0x3db   : > { %2412 = vmatprep.subr.mxu1 %v2313_v34 }
 0x3dc   : > { %v4027_v10 = vpop.f32.mrf.mxu0  ;;  %2413 = vmatpush1.msra.mxu1 %v2312_v35  ;;  %v1919_v4 = vpop.permute.xlu0 %1918 }
 0x3dd   : > { %2414 = vmatprep.subr.mxu1 %v2311_v19  ;;  %v1914_v23 = vpop.permute.xlu1 %1913 }
 0x3de   : > { %v4031_v60 = vpop.f32.mrf.mxu0  ;;  %2415 = vmatpush1.msra.mxu1 %v2310_v36 }
 0x3df   : > { %2416 = vmatprep.subr.mxu1 %v2309_v7 }
 0x3e0   : > { %v4033_v21 = vpop.f32.mrf.mxu0  ;;  %2417 = vmatpush1.msra.mxu1 %v2308_v18  ;;  %v1909_v7 = vpop.permute.xlu0 %1908 }
 0x3e1   : > { %2418 = vmatprep.subr.mxu1 %v2307_v53 }
 0x3e2   : > { %v4035_v43 = vpop.f32.mrf.mxu0  ;;  %2419 = vmatpush1.msra.mxu1 %v2306_v26 }
 0x3e3   : > { %2420 = vmatprep.subr.mxu1 %v2305_v20  ;;  %v1904_v20 = vpop.permute.xlu1 %1903 }
 0x3e4   : > { %v2267_v58 = vpop.f32.mrf.mxu0  ;;  %2421 = vmatpush1.msra.mxu1 %v2304_v15 }
 0x3e6   : > { %v2269_v28 = vpop.f32.mrf.mxu0 }
 0x3e8   : > { %v2271_v41 = vpop.f32.mrf.mxu0 }
 0x3ea   : > { %v2275_v51 = vpop.f32.mrf.mxu0 }
 0x3eb   : > { %v2276_v15 = vadd.f32 %v2275_v51, %v1924_v24  ;;  %v1894_v51 = vpop.permute.xlu1 %1893 }
 0x3ec   : > { %v2277_v13 = vpop.f32.mrf.mxu0 }
 0x3ed   : > { %v2278_v53 = vadd.f32 %v2277_v13, %v1924_v24  ;;  %v2262_v13 = vadd.f32 %v4033_v21, %v1909_v7 }
 0x3ee   : > { %v2279_v17 = vpop.f32.mrf.mxu0 }
 0x3ef   : > { %v2280_v54 = vadd.f32 %v2279_v17, %v1929_v33  ;;  %v2266_v17 = vadd.f32 %v4035_v43, %v1914_v23 }
 0x3f0   : > { %v2281_v1 = vpop.f32.mrf.mxu0 }
 0x3f1   : > { %v2282_v36 = vadd.f32 %v2281_v1, %v1929_v33  ;;  %v2268_v1 = vadd.f32 %v2267_v58, %v1914_v23  ;;  %v2256_v58 = vadd.f32 %v4023_v59, %v1904_v20  ;;  %v2352_v24 = vmax.f32 %v2266_v17, 0.0 }
 0x3f2   : > { %v2285_v47 = vpop.f32.mrf.mxu0 }
 0x3f3   : > { %v2286_v3 = vadd.f32 %v2285_v47, %v1934_v9  ;;  %v2270_v47 = vadd.f32 %v2269_v28, %v1919_v4  ;;  %v2258_v28 = vadd.f32 %v4027_v10, %v1904_v20  ;;  %v1884_v10 = vpop.permute.xlu1 %1883 }
 0x3f4   : > { %v2287_v22 = vpop.f32.mrf.mxu0  ;;  %v2236_v23 = vadd.f32 %v3993_v62, %v1884_v10  ;;  %v2377_v62 = vsub.s32 0, %v3970_v16 }
 0x3f5   : > { %v2288_v50 = vadd.f32 %v2287_v22, %v1934_v9  ;;  %v2359_v22 = vmax.f32 %v2282_v36, 0.0  ;;  %v1899_v9 = vpop.permute.xlu0 %1898  ;;  %v2354_v33 = vmax.f32 %v2270_v47, 0.0 }
 0x3f6   : > { %v2289_v45 = vpop.f32.mrf.mxu0  ;;  %v2252_v43 = vadd.f32 %v4019_v44, %v1899_v9 }
 0x3f7   : > { %v2290_v2 = vadd.f32 %v2289_v45, %v1939_v63  ;;  %v2361_v26 = vmax.f32 %v2288_v50, 0.0  ;;  %v2357_v45 = vmax.f32 %v2278_v53, 0.0 }
 0x3f8   : > { %v2291_v46 = vpop.f32.mrf.mxu0 }
 0x3f9   : > { %v2292_v5 = vadd.f32 %v2291_v46, %v1939_v63  ;;  %v2362_v18 = vmax.f32 %v2290_v2, 0.0  ;;  %v2358_v63 = vmax.f32 %v2280_v54, 0.0  ;;  %v2356_v46 = vmax.f32 %v2276_v15, 0.0  ;;  %v1889_v21 = vpop.permute.xlu0 %1888 }
 0x3fa   : > { %v2295_v6 = vpop.f32.mrf.mxu0  ;;  %v2242_v59 = vadd.f32 %v4003_v11, %v1889_v21  ;;  %v2240_v44 = vadd.f32 %v3999_v55, %v1889_v21  ;;  %v1874_v11 = vpop.permute.xlu1 %1873 }
 0x3fb   : > { %v2296_v39 = vadd.f32 %v2295_v6, %v1944_v31  ;;  %v2363_v0 = vmax.f32 %v2292_v5, 0.0  ;;  %v2228_v55 = vadd.f32 %v3987_v29, %v1874_v11  ;;  %v2828_v29 = vmov 1966171168  }
 0x3fc   : > { %v2297_v32 = vpop.f32.mrf.mxu0 }
 0x3fd   : > { %v2298_v48 = vadd.f32 %v2297_v32, %v1944_v31  ;;  %v2364_v40 = vmax.f32 %v2296_v39, 0.0  ;;  %v2272_v31 = vadd.f32 %v2271_v41, %v1919_v4  ;;  %v2260_v41 = vadd.f32 %v4031_v60, %v1909_v7 }
 0x3fe   : > { %v2299_v27 = vpop.f32.mrf.mxu0  ;;  %v2353_v32 = vmax.f32 %v2268_v1, 0.0  ;;  %v2248_v60 = vadd.f32 %v4011_v49, %v1894_v51  ;;  %v2348_v4 = vmax.f32 %v2256_v58, 0.0  ;;  %v2347_v39 = vmax.f32 %v2252_v43, 0.0  ;;  %v1879_v49 = vpop.permute.xlu0 %1878 }
 0x3ff   : > { %v2300_v30 = vadd.f32 %v2299_v27, %v1949_v25  ;;  %v2365_v19 = vmax.f32 %v2298_v48, 0.0  ;;  %v2355_v6 = vmax.f32 %v2272_v31, 0.0  ;;  %v2351_v27 = vmax.f32 %v2262_v13, 0.0 }
 0x400   : > { %v2301_v57 = vpop.f32.mrf.mxu0  ;;  %v2349_v48 = vmax.f32 %v2258_v28, 0.0  ;;  %v2230_v50 = vadd.f32 %v3989_v8, %v1879_v49  ;;  %v2337_v7 = vmax.f32 %v2228_v55, 0.0 }
 0x401   : > { %v2302_v37 = vadd.f32 %v2301_v57, %v1949_v25  ;;  %v2366_v35 = vmax.f32 %v2300_v30, 0.0  ;;  %v2360_v25 = vmax.f32 %v2286_v3, 0.0  ;;  %v2250_v30 = vadd.f32 %v4015_v56, %v1899_v9 }
 0x402   : > { %v2350_v57 = vmax.f32 %v2260_v41, 0.0  ;;  %v2238_v56 = vadd.f32 %v3995_v42, %v1884_v10  ;;  %v2226_v42 = vadd.f32 %v3985_v38, %v1874_v11  ;;  %v2465_v38 = vunpack.c.l.s4 %v2828_v29  ;;  %v2373_v54 = vpop.permute.xlu0 %2372 }
 0x403   : > { %v2367_v34 = vmax.f32 %v2302_v37, 0.0  ;;  %v2246_v37 = vadd.f32 %v4007_v61, %v1894_v51  ;;  %v2346_v5 = vmax.f32 %v2250_v30, 0.0  ;;  %v2232_v61 = vadd.f32 %v3991_v14, %v1879_v49 }
 0x404   : > { %v2341_v3 = vmax.f32 %v2238_v56, 0.0  ;;  %v2338_v14 = vmax.f32 %v2230_v50, 0.0  ;;  %v2336_v8 = vmax.f32 %v2226_v42, 0.0 }
 0x405   : > { %2422 = vmatprep.subr.mxu1 %v2367_v34  ;;  %v2345_v34 = vmax.f32 %v2248_v60, 0.0  ;;  %v2344_v2 = vmax.f32 %v2246_v37, 0.0  ;;  %v2339_v36 = vmax.f32 %v2232_v61, 0.0 }
 0x406   : > { %2423 = vmatpush2.msra.mxu1 %v2366_v35  ;;  %v2343_v35 = vmax.f32 %v2242_v59, 0.0 }
 0x407   : > { %2424 = vmatprep.subr.mxu1 %v2365_v19  ;;  %v2342_v19 = vmax.f32 %v2240_v44, 0.0 }
 0x408   : > { %2425 = vmatpush2.msra.mxu1 %v2364_v40  ;;  %v2340_v40 = vmax.f32 %v2236_v23, 0.0 }
 0x409   : > { %2426 = vmatprep.subr.mxu1 %v2363_v0  ;;  %v2383_v0 = vrot.slane %v3975_v52, %v2377_v62 }
 0x40a   : > { %2427 = vmatpush2.msra.mxu1 %v2362_v18  ;;  %v2466_v18 = vunpack.c.0.s8 %v2465_v38 }
 0x40b   : > { %2428 = vmatprep.subr.mxu1 %v2361_v26  ;;  %v2378_v26 = vrot.slane %v2373_v54, %v2377_v62 }
 0x40c   : > { %2429 = vmatpush2.msra.mxu1 %v2360_v25  ;;  %v2469_v31 = vsub.s32 %v2466_v18, %v3970_v16 }
 0x40d   : > { %2430 = vmatprep.subr.mxu1 %v2359_v22 }
 0x40e   : > { %2431 = vmatpush2.msra.mxu1 %v2358_v63 }
 0x40f   : > { %2432 = vmatprep.subr.mxu1 %v2357_v45 }
 0x410   : > { %2433 = vmatpush2.msra.mxu1 %v2356_v46 }
 0x411   : > { %2434 = vmatprep.subr.mxu1 %v2355_v6 }
 0x412   : > { %2435 = vmatpush2.msra.mxu1 %v2354_v33 }
 0x413   : > { %2436 = vmatprep.subr.mxu1 %v2353_v32 }
 0x414   : > { %2437 = vmatpush2.msra.mxu1 %v2352_v24 }
 0x415   : > { %2438 = vmatprep.subr.mxu1 %v2351_v27 }
 0x416   : > { %2439 = vmatpush2.msra.mxu1 %v2350_v57 }
 0x417   : > { %2440 = vmatprep.subr.mxu1 %v2349_v48 }
 0x418   : > { %2441 = vmatpush2.msra.mxu1 %v2348_v4 }
 0x419   : > { %2442 = vmatprep.subr.mxu1 %v2347_v39 }
 0x41a   : > { %2443 = vmatpush2.msra.mxu1 %v2346_v5 }
 0x41b   : > { %2444 = vmatprep.subr.mxu1 %v2345_v34 }
 0x41c   : > { %2445 = vmatpush2.msra.mxu1 %v2344_v2 }
 0x41d   : > { %2446 = vmatprep.subr.mxu1 %v2343_v35 }
 0x41e   : > { %2447 = vmatpush2.msra.mxu1 %v2342_v19 }
 0x41f   : > { %2448 = vmatprep.subr.mxu1 %v2341_v3 }
 0x420   : > { %2449 = vmatpush2.msra.mxu1 %v2340_v40 }
 0x421   : > { %2450 = vmatprep.subr.mxu1 %v2339_v36 }
 0x422   : > { %2451 = vmatpush2.msra.mxu1 %v2338_v14 }
 0x423   : > { %2452 = vmatprep.subr.mxu1 %v2337_v7 }
 0x424   : > { %2453 = vmatpush2.msra.mxu1 %v2336_v8 }
 0x425   : > { %2455 = vmatmul.mubr.f32.vlgmr.msra.gmra.mxu1 %v2383_v0 }
 0x4e5   : > { %v2456_v53 = vpop.f32.mrf.mxu1 }
 0x4e6   : > { %v2457_v15 = vadd.f32 %v2456_v53, %v2378_v26 }
 0x4e7   : > { %v2458_v20 = vpop.f32.mrf.mxu1 }
 0x4e8   : > { %v2459_v25 = vadd.f32 %v2458_v20, %v2378_v26 }
 0x4ea   : > { %v2463_v52 = vcombine.low %v2457_v15, %v2459_v25 }
 0x4ec   : > { %v2470_v22 = vrot.slane %v2463_v52, %v2469_v31 }
 0x4ee   : > { %v2477_v47 = vrot.slane %v2470_v22, %v2469_v31 }
 0x4f0   : > { %2483 = vst.msk [vmem:[%s370_s29] sm:$0x3] %vm2481_vm2, %v2477_v47 }
 0x4f1 PF: > { %s21_s13 = sadd.s32 1, %s2824_s13   ;;  %s4148_s11 = smov %s2820_s12 }
 0x4f2   : > { %p18_p5 = scmp.ge.s32.totalorder %s21_s13, 4   ;;  %s4149_s12 = smov %s4151_s8 }
 0x4f4   :  { %20 = sbr.rel (!%p18_p5) target bundleno = 3 (0x3), region = 86 }

</bundles_post_ra>
